<compile_context>
chip_gen: v7x
topology: tpu7x:2x2x1
jax: 0.10.0
libtpu: 0.0.40
codegen_flags: <defaults>
</compile_context>

<pallas_src>
import functools

import jax
import jax.numpy as jnp
from jax.experimental import pallas as pl
from jax.experimental.pallas import tpu as pltpu

LANE = 128      # TPU lane width; Cout is padded up to this for lane-dense stores
TAPS_PAD = 32   # 27 conv taps padded to 32 so K = 32*Cin is lane friendly
TM_MAX = 1024   # max row tile; (TM, K) bf16 + (TM, 128) f32 tiles stay << VMEM


def _round_up(x, m):
    return ((x + m - 1) // m) * m


# ----------------------------------------------------------------------------
# Pallas kernels: fused (patches @ w_scaled) + bias [+ residual] [+ relu]
# ----------------------------------------------------------------------------
def _matmul_bn_kernel(x_ref, w_ref, bias_ref, o_ref, *, relu):
    acc = jnp.dot(x_ref[...], w_ref[...], preferred_element_type=jnp.float32)
    y = acc + bias_ref[...]
    if relu:
        y = jnp.maximum(y, 0.0)
    o_ref[...] = y.astype(o_ref.dtype)


def _matmul_bn_res_kernel(x_ref, w_ref, bias_ref, res_ref, o_ref, *, relu):
    acc = jnp.dot(x_ref[...], w_ref[...], preferred_element_type=jnp.float32)
    y = acc + bias_ref[...] + res_ref[...]
    if relu:
        y = jnp.maximum(y, 0.0)
    o_ref[...] = y.astype(o_ref.dtype)


def fused_matmul_bn(patches, w, bias, residual=None, relu=True):
    """patches: (M, K) bf16; w: (K, Cp) bf16 (BN scale folded, Cp lane-padded);
    bias: (1, Cp) f32; residual: (M, Cp) f32 or None.  Returns (M, Cp) f32."""
    M, K = patches.shape
    Cp = w.shape[1]
    TM = min(TM_MAX, _round_up(M, 8))
    grid = (pl.cdiv(M, TM),)

    in_specs = [
        pl.BlockSpec((TM, K), lambda i: (i, 0)),    # patches row tile (bf16)
        pl.BlockSpec((K, Cp), lambda i: (0, 0)),    # full weight (bf16)
        pl.BlockSpec((1, Cp), lambda i: (0, 0)),    # folded BN bias (f32)
    ]
    args = [patches, w, bias]
    bytes_accessed = M * K * 2 + K * Cp * 2 + Cp * 4 + M * Cp * 4
    if residual is None:
        kernel = functools.partial(_matmul_bn_kernel, relu=relu)
    else:
        in_specs.append(pl.BlockSpec((TM, Cp), lambda i: (i, 0)))
        args.append(residual)
        bytes_accessed += M * Cp * 4
        kernel = functools.partial(_matmul_bn_res_kernel, relu=relu)

    return pl.pallas_call(
        kernel,
        out_shape=jax.ShapeDtypeStruct((M, Cp), jnp.float32),
        grid_spec=pltpu.PrefetchScalarGridSpec(
            num_scalar_prefetch=0,
            grid=grid,
            in_specs=in_specs,
            out_specs=pl.BlockSpec((TM, Cp), lambda i: (i, 0)),
        ),
        compiler_params=pltpu.CompilerParams(
            dimension_semantics=("parallel",)),
        cost_estimate=pl.CostEstimate(
            flops=2 * M * K * Cp,
            transcendentals=0,
            bytes_accessed=bytes_accessed),
    )(*args)


# ----------------------------------------------------------------------------
# JAX glue: im2col for 3D conv / transposed 3D conv (kernel_size=3), bf16 out
# ----------------------------------------------------------------------------
def im2col_3d(x, stride, pad_lo=1, pad_hi=1):
    """x: (N, D, H, W, C) -> ((M, TAPS_PAD*C) bf16, (N, Do, Ho, Wo))."""
    N, D, H, W, C = x.shape
    xp = jnp.pad(x.astype(jnp.bfloat16),
                 ((0, 0), (pad_lo, pad_hi), (pad_lo, pad_hi),
                  (pad_lo, pad_hi), (0, 0)))
    Do = (D + pad_lo + pad_hi - 3) // stride + 1
    Ho = (H + pad_lo + pad_hi - 3) // stride + 1
    Wo = (W + pad_lo + pad_hi - 3) // stride + 1
    cols = []
    for kd in range(3):
        for kh in range(3):
            for kw in range(3):
                cols.append(xp[:, kd:kd + stride * (Do - 1) + 1:stride,
                                  kh:kh + stride * (Ho - 1) + 1:stride,
                                  kw:kw + stride * (Wo - 1) + 1:stride, :])
    zero = jnp.zeros_like(cols[0])
    cols.extend([zero] * (TAPS_PAD - 27))          # pad taps 27 -> 32
    p = jnp.stack(cols, axis=4)                    # (N, Do, Ho, Wo, 32, C)
    return p.reshape(N * Do * Ho * Wo, TAPS_PAD * C), (N, Do, Ho, Wo)


def _dilate(x, stride):
    if stride == 1:
        return x
    N, D, H, W, C = x.shape
    y = jnp.zeros((N, (D - 1) * stride + 1, (H - 1) * stride + 1,
                   (W - 1) * stride + 1, C), x.dtype)
    return y.at[:, ::stride, ::stride, ::stride, :].set(x)


def im2col_transpose3d(x, stride=2, pad=1, output_padding=1):
    """ConvTranspose3d(k=3, stride=2, pad=1, out_pad=1) as dilated stride-1 conv."""
    lo = 3 - 1 - pad                     # = 1
    hi = 3 - 1 - pad + output_padding    # = 2
    return im2col_3d(_dilate(x, stride), stride=1, pad_lo=lo, pad_hi=hi)


# ----------------------------------------------------------------------------
# Deterministic parameter construction (PyTorch layouts respected)
# ----------------------------------------------------------------------------
def _bn_affine(keys, cout):
    gamma = 1.0 + 0.1 * jax.random.normal(keys[0], (cout,), jnp.float32)
    beta = 0.1 * jax.random.normal(keys[1], (cout,), jnp.float32)
    mean = 0.1 * jax.random.normal(keys[2], (cout,), jnp.float32)
    var = 1.0 + 0.1 * jax.random.uniform(keys[3], (cout,), jnp.float32)
    scale = gamma / jnp.sqrt(var + 1e-5)
    bias = beta - mean * scale
    return scale, bias


def _pack(w_dhw_io, scale, bias_vec):
    """(3,3,3,Cin,Cout) f32 weight + folded BN -> (w2d bf16, bias f32, cout)."""
    cin, cout = w_dhw_io.shape[3], w_dhw_io.shape[4]
    cp = _round_up(cout, LANE)
    w = (w_dhw_io * scale).reshape(27, cin, cout)          # fold BN scale
    w = jnp.pad(w, ((0, TAPS_PAD - 27), (0, 0), (0, cp - cout)))
    w2d = w.reshape(TAPS_PAD * cin, cp).astype(jnp.bfloat16)
    bias_p = jnp.pad(bias_vec, (0, cp - cout)).reshape(1, cp).astype(jnp.float32)
    return w2d, bias_p, cout


def make_conv_params(key, cin, cout):
    ks = jax.random.split(key, 5)
    # PyTorch Conv3d weight layout: (Cout, Cin, kD, kH, kW)
    w = 0.1 * jax.random.normal(ks[0], (cout, cin, 3, 3, 3), jnp.float32)
    scale, bias = _bn_affine(ks[1:], cout)
    return _pack(jnp.transpose(w, (2, 3, 4, 1, 0)), scale, bias)


def make_deconv_params(key, cin, cout):
    ks = jax.random.split(key, 5)
    # PyTorch ConvTranspose3d weight layout: (Cin, Cout, kD, kH, kW)
    w = 0.1 * jax.random.normal(ks[0], (cin, cout, 3, 3, 3), jnp.float32)
    w_eff = jnp.flip(w, axis=(2, 3, 4))                    # spatial flip
    scale, bias = _bn_affine(ks[1:], cout)
    return _pack(jnp.transpose(w_eff, (2, 3, 4, 0, 1)), scale, bias)


# ----------------------------------------------------------------------------
# hourglass forward
# ----------------------------------------------------------------------------
def conv_stage(x, params, *, stride=1, transpose=False, residual=None, relu=True):
    """x: (N, D, H, W, C) f32; residual: channels-last map of the output shape."""
    w2d, bias, cout = params
    cp = w2d.shape[1]
    if transpose:
        patches, shp = im2col_transpose3d(x, stride=2)
    else:
        patches, shp = im2col_3d(x, stride=stride)
    res = None
    if residual is not None:
        res = residual.astype(jnp.float32).reshape(-1, residual.shape[-1])
        res = jnp.pad(res, ((0, 0), (0, cp - res.shape[1])))
    y = fused_matmul_bn(patches, w2d, bias, residual=res, relu=relu)
    return y[:, :cout].reshape(*shp, cout)


def hourglass_forward(x_ncdhw, params, presqu=None, postsqu=None):
    x = jnp.transpose(x_ncdhw, (0, 2, 3, 4, 1))            # NCDHW -> NDHWC
    to_ndhwc = lambda t: jnp.transpose(t, (0, 2, 3, 4, 1))
    back = lambda t: jnp.transpose(t, (0, 4, 1, 2, 3))     # NDHWC -> NCDHW

    # conv1: conv(s=2) + BN + ReLU
    out1 = conv_stage(x, params['conv1'], stride=2, relu=True)

    # conv2: conv(s=1) + BN, then (+ postsqu) ReLU
    res2 = None if postsqu is None else to_ndhwc(postsqu)
    pre = conv_stage(out1, params['conv2'], stride=1, residual=res2, relu=True)

    # conv3: conv(s=2) + BN + ReLU
    o3 = conv_stage(pre, params['conv3'], stride=2, relu=True)

    # conv4: conv(s=1) + BN + ReLU
    o4 = conv_stage(o3, params['conv4'], stride=1, relu=True)

    # conv5: convT(s=2) + BN, + (presqu or pre), ReLU
    res5 = pre if presqu is None else to_ndhwc(presqu)
    post = conv_stage(o4, params['conv5'], transpose=True, residual=res5,
                      relu=True)

    # conv6: convT(s=2) + BN (no ReLU)
    out6 = conv_stage(post, params['conv6'], transpose=True, relu=False)

    return back(out6), back(pre), back(post)


# ----------------------------------------------------------------------------
if __name__ == "__main__":
    key = jax.random.PRNGKey(0)
    inplanes = 4
    N, D, H, W = 2, 8, 8, 8
    keys = jax.random.split(key, 7)

    x = jax.random.normal(keys[0], (N, inplanes, D, H, W), jnp.float32)

    params = {
        'conv1': make_conv_params(keys[1], inplanes, inplanes * 2),
        'conv2': make_conv_params(keys[2], inplanes * 2, inplanes * 2),
        'conv3': make_conv_params(keys[3], inplanes * 2, inplanes * 2),
        'conv4': make_conv_params(keys[4], inplanes * 2, inplanes * 2),
        'conv5': make_deconv_params(keys[5], inplanes * 2, inplanes * 2),
        'conv6': make_deconv_params(keys[6], inplanes * 2, inplanes),
    }

    # forward(x, presqu=None, postsqu=None)
    fwd = jax.jit(lambda xx: hourglass_forward(xx, params, None, None))
    out, pre, post = fwd(x)
    jax.block_until_ready((out, pre, post))

    assert out.shape == (N, inplanes, D, H, W)
    assert pre.shape == (N, inplanes * 2, D // 2, H // 2, W // 2)
    assert post.shape == (N, inplanes * 2, D // 2, H // 2, W // 2)
    assert bool(jnp.all(jnp.isfinite(out)))
    print("KERNEL_OK")
</pallas_src>

<mosaic_0001>
module attributes {stable_mosaic.version = 11 : i64} {
  func.func @_matmul_bn_kernel(%arg0: i32, %arg1: memref<128x128xbf16, #tpu.memory_space<vmem>>, %arg2: memref<128x128xbf16, #tpu.memory_space<vmem>>, %arg3: memref<1x128xf32, #tpu.memory_space<vmem>>, %arg4: memref<128x128xf32, #tpu.memory_space<vmem>>) attributes {dimension_semantics = [#tpu.dimension_semantics<parallel>], iteration_bounds = array<i64: 1>, scalar_prefetch = 0 : i64, scratch_operands = 0 : i64, tpu.core_type = #tpu.core_type<tc>, window_params = [{transform_indices = @transform_0, window_bounds = array<i64: 128, 128>}, {pipeline_mode = #tpu.pipeline_mode<synchronous>, transform_indices = @transform_1, window_bounds = array<i64: 128, 128>}, {pipeline_mode = #tpu.pipeline_mode<synchronous>, transform_indices = @transform_2, window_bounds = array<i64: 1, 128>}, {transform_indices = @transform_3, window_bounds = array<i64: 128, 128>}]} {
    %c0 = arith.constant 0 : index
    %c0_0 = arith.constant 0 : index
    %0 = vector.load %arg1[%c0, %c0_0] : memref<128x128xbf16, #tpu.memory_space<vmem>>, vector<128x128xbf16>
    %c0_1 = arith.constant 0 : index
    %c0_2 = arith.constant 0 : index
    %1 = vector.load %arg2[%c0_1, %c0_2] : memref<128x128xbf16, #tpu.memory_space<vmem>>, vector<128x128xbf16>
    %cst = arith.constant dense<0.000000e+00> : vector<128x128xf32>
    %2 = tpu.matmul %0, %1, %cst {dimension_numbers = #tpu.dot_dimension_numbers<[1], [0], [0], [1], [0, 0, 1, 1], [], []>} : vector<128x128xbf16>, vector<128x128xbf16>, vector<128x128xf32> -> vector<128x128xf32>
    %c0_3 = arith.constant 0 : index
    %c0_4 = arith.constant 0 : index
    %3 = vector.load %arg3[%c0_3, %c0_4] : memref<1x128xf32, #tpu.memory_space<vmem>>, vector<1x128xf32>
    %4 = vector.broadcast %3 : vector<1x128xf32> to vector<128x128xf32>
    %5 = arith.addf %2, %4 : vector<128x128xf32>
    %cst_5 = arith.constant 0.000000e+00 : f32
    %6 = vector.broadcast %cst_5 : f32 to vector<128x128xf32>
    %7 = arith.maximumf %5, %6 : vector<128x128xf32>
    %c0_6 = arith.constant 0 : index
    %c0_7 = arith.constant 0 : index
    %8 = vector.load %arg4[%c0_6, %c0_7] : memref<128x128xf32, #tpu.memory_space<vmem>>, vector<128x128xf32>
    tpu.vector_store %arg4[%c0_6, %c0_7], %7 {strides = array<i32>} : memref<128x128xf32, #tpu.memory_space<vmem>>, vector<128x128xf32>,
    return
  }
  func.func @transform_0(%arg0: i32) -> (i32, i32) {
    %c0_i32 = arith.constant 0 : i32
    %c0_i32_0 = arith.constant 0 : i32
    return %arg0, %c0_i32 : i32, i32
  }
  func.func @transform_1(%arg0: i32) -> (i32, i32) {
    %c0_i32 = arith.constant 0 : i32
    %c0_i32_0 = arith.constant 0 : i32
    %c0_i32_1 = arith.constant 0 : i32
    return %c0_i32, %c0_i32_0 : i32, i32
  }
  func.func @transform_2(%arg0: i32) -> (i32, i32) {
    %c0_i32 = arith.constant 0 : i32
    %c0_i32_0 = arith.constant 0 : i32
    %c0_i32_1 = arith.constant 0 : i32
    return %c0_i32, %c0_i32_0 : i32, i32
  }
  func.func @transform_3(%arg0: i32) -> (i32, i32) {
    %c0_i32 = arith.constant 0 : i32
    %c0_i32_0 = arith.constant 0 : i32
    return %arg0, %c0_i32 : i32, i32
  }
}

module attributes {stable_mosaic.version = 11 : i64} {
  func.func @_matmul_bn_kernel(%arg0: i32, %arg1: memref<128x256xbf16, #tpu.memory_space<vmem>>, %arg2: memref<256x128xbf16, #tpu.memory_space<vmem>>, %arg3: memref<1x128xf32, #tpu.memory_space<vmem>>, %arg4: memref<128x128xf32, #tpu.memory_space<vmem>>) attributes {dimension_semantics = [#tpu.dimension_semantics<parallel>], iteration_bounds = array<i64: 1>, scalar_prefetch = 0 : i64, scratch_operands = 0 : i64, tpu.core_type = #tpu.core_type<tc>, window_params = [{transform_indices = @transform_0, window_bounds = array<i64: 128, 256>}, {pipeline_mode = #tpu.pipeline_mode<synchronous>, transform_indices = @transform_1, window_bounds = array<i64: 256, 128>}, {pipeline_mode = #tpu.pipeline_mode<synchronous>, transform_indices = @transform_2, window_bounds = array<i64: 1, 128>}, {transform_indices = @transform_3, window_bounds = array<i64: 128, 128>}]} {
    %c0 = arith.constant 0 : index
    %c0_0 = arith.constant 0 : index
    %0 = vector.load %arg1[%c0, %c0_0] : memref<128x256xbf16, #tpu.memory_space<vmem>>, vector<128x256xbf16>
    %c0_1 = arith.constant 0 : index
    %c0_2 = arith.constant 0 : index
    %1 = vector.load %arg2[%c0_1, %c0_2] : memref<256x128xbf16, #tpu.memory_space<vmem>>, vector<256x128xbf16>
    %cst = arith.constant dense<0.000000e+00> : vector<128x128xf32>
    %2 = tpu.matmul %0, %1, %cst {dimension_numbers = #tpu.dot_dimension_numbers<[1], [0], [0], [1], [0, 0, 1, 1], [], []>} : vector<128x256xbf16>, vector<256x128xbf16>, vector<128x128xf32> -> vector<128x128xf32>
    %c0_3 = arith.constant 0 : index
    %c0_4 = arith.constant 0 : index
    %3 = vector.load %arg3[%c0_3, %c0_4] : memref<1x128xf32, #tpu.memory_space<vmem>>, vector<1x128xf32>
    %4 = vector.broadcast %3 : vector<1x128xf32> to vector<128x128xf32>
    %5 = arith.addf %2, %4 : vector<128x128xf32>
    %cst_5 = arith.constant 0.000000e+00 : f32
    %6 = vector.broadcast %cst_5 : f32 to vector<128x128xf32>
    %7 = arith.maximumf %5, %6 : vector<128x128xf32>
    %c0_6 = arith.constant 0 : index
    %c0_7 = arith.constant 0 : index
    %8 = vector.load %arg4[%c0_6, %c0_7] : memref<128x128xf32, #tpu.memory_space<vmem>>, vector<128x128xf32>
    tpu.vector_store %arg4[%c0_6, %c0_7], %7 {strides = array<i32>} : memref<128x128xf32, #tpu.memory_space<vmem>>, vector<128x128xf32>,
    return
  }
  func.func @transform_0(%arg0: i32) -> (i32, i32) {
    %c0_i32 = arith.constant 0 : i32
    %c0_i32_0 = arith.constant 0 : i32
    return %arg0, %c0_i32 : i32, i32
  }
  func.func @transform_1(%arg0: i32) -> (i32, i32) {
    %c0_i32 = arith.constant 0 : i32
    %c0_i32_0 = arith.constant 0 : i32
    %c0_i32_1 = arith.constant 0 : i32
    return %c0_i32, %c0_i32_0 : i32, i32
  }
  func.func @transform_2(%arg0: i32) -> (i32, i32) {
    %c0_i32 = arith.constant 0 : i32
    %c0_i32_0 = arith.constant 0 : i32
    %c0_i32_1 = arith.constant 0 : i32
    return %c0_i32, %c0_i32_0 : i32, i32
  }
  func.func @transform_3(%arg0: i32) -> (i32, i32) {
    %c0_i32 = arith.constant 0 : i32
    %c0_i32_0 = arith.constant 0 : i32
    return %arg0, %c0_i32 : i32, i32
  }
}

module attributes {stable_mosaic.version = 11 : i64} {
  func.func @_matmul_bn_kernel(%arg0: i32, %arg1: memref<16x256xbf16, #tpu.memory_space<vmem>>, %arg2: memref<256x128xbf16, #tpu.memory_space<vmem>>, %arg3: memref<1x128xf32, #tpu.memory_space<vmem>>, %arg4: memref<16x128xf32, #tpu.memory_space<vmem>>) attributes {dimension_semantics = [#tpu.dimension_semantics<parallel>], iteration_bounds = array<i64: 1>, scalar_prefetch = 0 : i64, scratch_operands = 0 : i64, tpu.core_type = #tpu.core_type<tc>, window_params = [{transform_indices = @transform_0, window_bounds = array<i64: 16, 256>}, {pipeline_mode = #tpu.pipeline_mode<synchronous>, transform_indices = @transform_1, window_bounds = array<i64: 256, 128>}, {pipeline_mode = #tpu.pipeline_mode<synchronous>, transform_indices = @transform_2, window_bounds = array<i64: 1, 128>}, {transform_indices = @transform_3, window_bounds = array<i64: 16, 128>}]} {
    %c0 = arith.constant 0 : index
    %c0_0 = arith.constant 0 : index
    %0 = vector.load %arg1[%c0, %c0_0] : memref<16x256xbf16, #tpu.memory_space<vmem>>, vector<16x256xbf16>
    %c0_1 = arith.constant 0 : index
    %c0_2 = arith.constant 0 : index
    %1 = vector.load %arg2[%c0_1, %c0_2] : memref<256x128xbf16, #tpu.memory_space<vmem>>, vector<256x128xbf16>
    %cst = arith.constant dense<0.000000e+00> : vector<16x128xf32>
    %2 = tpu.matmul %0, %1, %cst {dimension_numbers = #tpu.dot_dimension_numbers<[1], [0], [0], [1], [0, 0, 1, 1], [], []>} : vector<16x256xbf16>, vector<256x128xbf16>, vector<16x128xf32> -> vector<16x128xf32>
    %c0_3 = arith.constant 0 : index
    %c0_4 = arith.constant 0 : index
    %3 = vector.load %arg3[%c0_3, %c0_4] : memref<1x128xf32, #tpu.memory_space<vmem>>, vector<1x128xf32>
    %4 = vector.broadcast %3 : vector<1x128xf32> to vector<16x128xf32>
    %5 = arith.addf %2, %4 : vector<16x128xf32>
    %cst_5 = arith.constant 0.000000e+00 : f32
    %6 = vector.broadcast %cst_5 : f32 to vector<16x128xf32>
    %7 = arith.maximumf %5, %6 : vector<16x128xf32>
    %c0_6 = arith.constant 0 : index
    %c0_7 = arith.constant 0 : index
    %8 = vector.load %arg4[%c0_6, %c0_7] : memref<16x128xf32, #tpu.memory_space<vmem>>, vector<16x128xf32>
    tpu.vector_store %arg4[%c0_6, %c0_7], %7 {strides = array<i32>} : memref<16x128xf32, #tpu.memory_space<vmem>>, vector<16x128xf32>,
    return
  }
  func.func @transform_0(%arg0: i32) -> (i32, i32) {
    %c0_i32 = arith.constant 0 : i32
    %c0_i32_0 = arith.constant 0 : i32
    return %arg0, %c0_i32 : i32, i32
  }
  func.func @transform_1(%arg0: i32) -> (i32, i32) {
    %c0_i32 = arith.constant 0 : i32
    %c0_i32_0 = arith.constant 0 : i32
    %c0_i32_1 = arith.constant 0 : i32
    return %c0_i32, %c0_i32_0 : i32, i32
  }
  func.func @transform_2(%arg0: i32) -> (i32, i32) {
    %c0_i32 = arith.constant 0 : i32
    %c0_i32_0 = arith.constant 0 : i32
    %c0_i32_1 = arith.constant 0 : i32
    return %c0_i32, %c0_i32_0 : i32, i32
  }
  func.func @transform_3(%arg0: i32) -> (i32, i32) {
    %c0_i32 = arith.constant 0 : i32
    %c0_i32_0 = arith.constant 0 : i32
    return %arg0, %c0_i32 : i32, i32
  }
}

module attributes {stable_mosaic.version = 11 : i64} {
  func.func @_matmul_bn_res_kernel(%arg0: i32, %arg1: memref<128x256xbf16, #tpu.memory_space<vmem>>, %arg2: memref<256x128xbf16, #tpu.memory_space<vmem>>, %arg3: memref<1x128xf32, #tpu.memory_space<vmem>>, %arg4: memref<128x128xf32, #tpu.memory_space<vmem>>, %arg5: memref<128x128xf32, #tpu.memory_space<vmem>>) attributes {dimension_semantics = [#tpu.dimension_semantics<parallel>], iteration_bounds = array<i64: 1>, scalar_prefetch = 0 : i64, scratch_operands = 0 : i64, tpu.core_type = #tpu.core_type<tc>, window_params = [{transform_indices = @transform_0, window_bounds = array<i64: 128, 256>}, {pipeline_mode = #tpu.pipeline_mode<synchronous>, transform_indices = @transform_1, window_bounds = array<i64: 256, 128>}, {pipeline_mode = #tpu.pipeline_mode<synchronous>, transform_indices = @transform_2, window_bounds = array<i64: 1, 128>}, {transform_indices = @transform_3, window_bounds = array<i64: 128, 128>}, {transform_indices = @transform_4, window_bounds = array<i64: 128, 128>}]} {
    %c0 = arith.constant 0 : index
    %c0_0 = arith.constant 0 : index
    %0 = vector.load %arg1[%c0, %c0_0] : memref<128x256xbf16, #tpu.memory_space<vmem>>, vector<128x256xbf16>
    %c0_1 = arith.constant 0 : index
    %c0_2 = arith.constant 0 : index
    %1 = vector.load %arg2[%c0_1, %c0_2] : memref<256x128xbf16, #tpu.memory_space<vmem>>, vector<256x128xbf16>
    %cst = arith.constant dense<0.000000e+00> : vector<128x128xf32>
    %2 = tpu.matmul %0, %1, %cst {dimension_numbers = #tpu.dot_dimension_numbers<[1], [0], [0], [1], [0, 0, 1, 1], [], []>} : vector<128x256xbf16>, vector<256x128xbf16>, vector<128x128xf32> -> vector<128x128xf32>
    %c0_3 = arith.constant 0 : index
    %c0_4 = arith.constant 0 : index
    %3 = vector.load %arg3[%c0_3, %c0_4] : memref<1x128xf32, #tpu.memory_space<vmem>>, vector<1x128xf32>
    %4 = vector.broadcast %3 : vector<1x128xf32> to vector<128x128xf32>
    %5 = arith.addf %2, %4 : vector<128x128xf32>
    %c0_5 = arith.constant 0 : index
    %c0_6 = arith.constant 0 : index
    %6 = vector.load %arg4[%c0_5, %c0_6] : memref<128x128xf32, #tpu.memory_space<vmem>>, vector<128x128xf32>
    %7 = arith.addf %5, %6 : vector<128x128xf32>
    %cst_7 = arith.constant 0.000000e+00 : f32
    %8 = vector.broadcast %cst_7 : f32 to vector<128x128xf32>
    %9 = arith.maximumf %7, %8 : vector<128x128xf32>
    %c0_8 = arith.constant 0 : index
    %c0_9 = arith.constant 0 : index
    %10 = vector.load %arg5[%c0_8, %c0_9] : memref<128x128xf32, #tpu.memory_space<vmem>>, vector<128x128xf32>
    tpu.vector_store %arg5[%c0_8, %c0_9], %9 {strides = array<i32>} : memref<128x128xf32, #tpu.memory_space<vmem>>, vector<128x128xf32>,
    return
  }
  func.func @transform_0(%arg0: i32) -> (i32, i32) {
    %c0_i32 = arith.constant 0 : i32
    %c0_i32_0 = arith.constant 0 : i32
    return %arg0, %c0_i32 : i32, i32
  }
  func.func @transform_1(%arg0: i32) -> (i32, i32) {
    %c0_i32 = arith.constant 0 : i32
    %c0_i32_0 = arith.constant 0 : i32
    %c0_i32_1 = arith.constant 0 : i32
    return %c0_i32, %c0_i32_0 : i32, i32
  }
  func.func @transform_2(%arg0: i32) -> (i32, i32) {
    %c0_i32 = arith.constant 0 : i32
    %c0_i32_0 = arith.constant 0 : i32
    %c0_i32_1 = arith.constant 0 : i32
    return %c0_i32, %c0_i32_0 : i32, i32
  }
  func.func @transform_3(%arg0: i32) -> (i32, i32) {
    %c0_i32 = arith.constant 0 : i32
    %c0_i32_0 = arith.constant 0 : i32
    return %arg0, %c0_i32 : i32, i32
  }
  func.func @transform_4(%arg0: i32) -> (i32, i32) {
    %c0_i32 = arith.constant 0 : i32
    %c0_i32_0 = arith.constant 0 : i32
    return %arg0, %c0_i32 : i32, i32
  }
}

module attributes {stable_mosaic.version = 11 : i64} {
  func.func @_matmul_bn_kernel(%arg0: i32, %arg1: memref<1024x256xbf16, #tpu.memory_space<vmem>>, %arg2: memref<256x128xbf16, #tpu.memory_space<vmem>>, %arg3: memref<1x128xf32, #tpu.memory_space<vmem>>, %arg4: memref<1024x128xf32, #tpu.memory_space<vmem>>) attributes {dimension_semantics = [#tpu.dimension_semantics<parallel>], iteration_bounds = array<i64: 1>, scalar_prefetch = 0 : i64, scratch_operands = 0 : i64, tpu.core_type = #tpu.core_type<tc>, window_params = [{transform_indices = @transform_0, window_bounds = array<i64: 1024, 256>}, {pipeline_mode = #tpu.pipeline_mode<synchronous>, transform_indices = @transform_1, window_bounds = array<i64: 256, 128>}, {pipeline_mode = #tpu.pipeline_mode<synchronous>, transform_indices = @transform_2, window_bounds = array<i64: 1, 128>}, {transform_indices = @transform_3, window_bounds = array<i64: 1024, 128>}]} {
    %c0 = arith.constant 0 : index
    %c0_0 = arith.constant 0 : index
    %0 = vector.load %arg1[%c0, %c0_0] : memref<1024x256xbf16, #tpu.memory_space<vmem>>, vector<1024x256xbf16>
    %c0_1 = arith.constant 0 : index
    %c0_2 = arith.constant 0 : index
    %1 = vector.load %arg2[%c0_1, %c0_2] : memref<256x128xbf16, #tpu.memory_space<vmem>>, vector<256x128xbf16>
    %cst = arith.constant dense<0.000000e+00> : vector<1024x128xf32>
    %2 = tpu.matmul %0, %1, %cst {dimension_numbers = #tpu.dot_dimension_numbers<[1], [0], [0], [1], [0, 0, 1, 1], [], []>} : vector<1024x256xbf16>, vector<256x128xbf16>, vector<1024x128xf32> -> vector<1024x128xf32>
    %c0_3 = arith.constant 0 : index
    %c0_4 = arith.constant 0 : index
    %3 = vector.load %arg3[%c0_3, %c0_4] : memref<1x128xf32, #tpu.memory_space<vmem>>, vector<1x128xf32>
    %4 = vector.broadcast %3 : vector<1x128xf32> to vector<1024x128xf32>
    %5 = arith.addf %2, %4 : vector<1024x128xf32>
    %c0_5 = arith.constant 0 : index
    %c0_6 = arith.constant 0 : index
    %6 = vector.load %arg4[%c0_5, %c0_6] : memref<1024x128xf32, #tpu.memory_space<vmem>>, vector<1024x128xf32>
    tpu.vector_store %arg4[%c0_5, %c0_6], %5 {strides = array<i32>} : memref<1024x128xf32, #tpu.memory_space<vmem>>, vector<1024x128xf32>,
    return
  }
  func.func @transform_0(%arg0: i32) -> (i32, i32) {
    %c0_i32 = arith.constant 0 : i32
    %c0_i32_0 = arith.constant 0 : i32
    return %arg0, %c0_i32 : i32, i32
  }
  func.func @transform_1(%arg0: i32) -> (i32, i32) {
    %c0_i32 = arith.constant 0 : i32
    %c0_i32_0 = arith.constant 0 : i32
    %c0_i32_1 = arith.constant 0 : i32
    return %c0_i32, %c0_i32_0 : i32, i32
  }
  func.func @transform_2(%arg0: i32) -> (i32, i32) {
    %c0_i32 = arith.constant 0 : i32
    %c0_i32_0 = arith.constant 0 : i32
    %c0_i32_1 = arith.constant 0 : i32
    return %c0_i32, %c0_i32_0 : i32, i32
  }
  func.func @transform_3(%arg0: i32) -> (i32, i32) {
    %c0_i32 = arith.constant 0 : i32
    %c0_i32_0 = arith.constant 0 : i32
    return %arg0, %c0_i32 : i32, i32
  }
}

</mosaic_0001>

<bundles_post_ra>
// kernel: _lambda_.6
= control target key start
LH: loop header
LB: loop body
LE: loop exit
PB: predicated region body
PF: predicated region fallthrough
CT: control target
= control target key end

     0   :  { %s499_s1 = inlined_call_operand.vmem [shape: bf16[128,128], index: 1, kind: input, shape index: {}]   ;;  %s500_s0 = inlined_call_operand.vmem [shape: bf16[128,128], index: 0, kind: input, shape index: {}]   ;;  %s501_s2 = inlined_call_operand.vmem [shape: f32[1,128], index: 2, kind: input, shape index: {}]   ;;  %s502_s3 = inlined_call_operand.vmem [shape: f32[128,128], index: 3, kind: output, shape index: {}]  }
   0x1   :  { %v364_v0 = vld [vmem:[%s499_s1] sm:$0xff]   ;;  %v365_v1 = vld [vmem:[%s499_s1 + $0x8] sm:$0xff]   ;;  %v366_v2 = vld [vmem:[%s499_s1 + $0x10] sm:$0xff]  }
   0x2   :  { %316 = vmatprep.subr.bf16.mxu0 %v364_v0  ;;  %348 = vmatprep.subr.bf16.mxu1 %v364_v0  ;;  %v367_v3 = vld [vmem:[%s499_s1 + $0x18] sm:$0xff]   ;;  %v372_v4 = vld [vmem:[%s500_s0] sm:$0xff]   ;;  %v369_v7 = vld [vmem:[%s499_s1 + $0x28] sm:$0xff]  }
   0x3   :  { %317 = vmatpush3.bf16.msra.mxu0 %v364_v0  ;;  %356 = vmatpush3.bf16.msra.mxu1 %v364_v0  ;;  %v373_v5 = vld [vmem:[%s500_s0 + $0x20] sm:$0xff]   ;;  %v370_v8 = vld [vmem:[%s499_s1 + $0x30] sm:$0xff]   ;;  %v371_v9 = vld [vmem:[%s499_s1 + $0x38] sm:$0xff]  }
   0x4   :  { %318 = vmatprep.subr.bf16.mxu0 %v365_v1  ;;  %349 = vmatprep.subr.bf16.mxu1 %v365_v1  ;;  %v368_v6 = vld [vmem:[%s499_s1 + $0x20] sm:$0xff]   ;;  %v374_v10 = vld [vmem:[%s500_s0 + $0x8] sm:$0xff]   ;;  %v376_v12 = vld [vmem:[%s500_s0 + $0x10] sm:$0xff]  }
   0x5   :  { %332 = vmatprep.mubr.bf16.mxu0 %v372_v4  ;;  %340 = vmatprep.mubr.bf16.mxu1 %v373_v5  ;;  %v375_v11 = vld [vmem:[%s500_s0 + $0x28] sm:$0xff]   ;;  %v377_v13 = vld [vmem:[%s500_s0 + $0x30] sm:$0xff]   ;;  %v378_v14 = vld [vmem:[%s500_s0 + $0x18] sm:$0xff]  }
   0x6   :  { %v379_v15 = vld [vmem:[%s500_s0 + $0x38] sm:$0xff]   ;;  %v283_v16 = vld [vmem:[%s501_s2] ss:$0 sm:$0xff] }
   0x7   :  { %319 = vmatpush3.bf16.msra.mxu0 %v365_v1  ;;  %357 = vmatpush3.bf16.msra.mxu1 %v365_v1 }
   0x8   :  { %320 = vmatprep.subr.bf16.mxu0 %v366_v2  ;;  %350 = vmatprep.subr.bf16.mxu1 %v366_v2 }
   0xb   :  { %321 = vmatpush3.bf16.msra.mxu0 %v366_v2  ;;  %358 = vmatpush3.bf16.msra.mxu1 %v366_v2 }
   0xc   :  { %322 = vmatprep.subr.bf16.mxu0 %v367_v3  ;;  %351 = vmatprep.subr.bf16.mxu1 %v367_v3 }
   0xf   :  { %323 = vmatpush3.bf16.msra.mxu0 %v367_v3  ;;  %359 = vmatpush3.bf16.msra.mxu1 %v367_v3 }
  0x10   :  { %324 = vmatprep.subr.bf16.mxu0 %v368_v6  ;;  %352 = vmatprep.subr.bf16.mxu1 %v368_v6 }
  0x13   :  { %325 = vmatpush3.bf16.msra.mxu0 %v368_v6  ;;  %360 = vmatpush3.bf16.msra.mxu1 %v368_v6 }
  0x14   :  { %326 = vmatprep.subr.bf16.mxu0 %v369_v7  ;;  %353 = vmatprep.subr.bf16.mxu1 %v369_v7 }
  0x17   :  { %327 = vmatpush3.bf16.msra.mxu0 %v369_v7  ;;  %361 = vmatpush3.bf16.msra.mxu1 %v369_v7 }
  0x18   :  { %328 = vmatprep.subr.bf16.mxu0 %v370_v8  ;;  %354 = vmatprep.subr.bf16.mxu1 %v370_v8 }
  0x1b   :  { %329 = vmatpush3.bf16.msra.mxu0 %v370_v8  ;;  %362 = vmatpush3.bf16.msra.mxu1 %v370_v8 }
  0x1c   :  { %330 = vmatprep.subr.bf16.mxu0 %v371_v9  ;;  %355 = vmatprep.subr.bf16.mxu1 %v371_v9 }
  0x1f   :  { %331 = vmatpush3.bf16.msra.mxu0 %v371_v9  ;;  %363 = vmatpush3.bf16.msra.mxu1 %v371_v9 }
  0x22   :  { %333 = vmatmul.mubr.bf16.vlgmr.msra.gmra.mrb[0].mxu0 %v374_v10  ;;  %341 = vmatmul.mubr.bf16.vlgmr.msra.gmra.mrb[0].mxu1 %v375_v11 }
  0x23   :  { %336 = vmatprep.mubr.bf16.mxu0 %v376_v12  ;;  %344 = vmatprep.mubr.bf16.mxu1 %v377_v13 }
  0x2a   :  { %337 = vmatmul.mubr.bf16.gmra.mrb[4].mxu0 %v378_v14  ;;  %345 = vmatmul.mubr.bf16.gmra.mrb[4].mxu1 %v379_v15 }
  0xf5   :  { %v334_v17 = vpop.f32.mrb[0].mxu0  ;;  %v342_v18 = vpop.f32.mrb[0].mxu1 }
  0xf6   :  { %v193_v19 = vadd.f32 %v334_v17, %v283_v16  ;;  %v225_v20 = vadd.f32 %v342_v18, %v283_v16  ;;  %v184_v21 = vpop.f32.mrb[1].mxu0  ;;  %v216_v22 = vpop.f32.mrb[1].mxu1 }
  0xf7   :  { %v185_v23 = vadd.f32 %v283_v16, %v184_v21  ;;  %v217_v24 = vadd.f32 %v283_v16, %v216_v22  ;;  %v335_v25 = vpop.f32.mrb[2].mxu0  ;;  %v343_v26 = vpop.f32.mrb[2].mxu1 }
  0xf8   :  { %v249_v27 = vmax.f32 %v193_v19, 0.0  ;;  %v257_v28 = vmax.f32 %v225_v20, 0.0  ;;  %v196_v29 = vadd.f32 %v335_v25, %v283_v16  ;;  %v228_v30 = vadd.f32 %v343_v26, %v283_v16  ;;  %v187_v31 = vpop.f32.mrb[3].mxu0  ;;  %v219_v32 = vpop.f32.mrb[3].mxu1 }
  0xf9   :  { %v247_v33 = vmax.f32 %v185_v23, 0.0  ;;  %v255_v34 = vmax.f32 %v217_v24, 0.0  ;;  %v188_v35 = vadd.f32 %v283_v16, %v187_v31  ;;  %v220_v36 = vadd.f32 %v283_v16, %v219_v32 }
  0xfa   :  { %265 = vst [vmem:[%s502_s3 + $0x10] sm:$0xff] %v249_v27  ;;  %273 = vst [vmem:[%s502_s3 + $0x50] sm:$0xff] %v257_v28  ;;  %v250_v37 = vmax.f32 %v196_v29, 0.0  ;;  %v258_v38 = vmax.f32 %v228_v30, 0.0 }
  0xfb   :  { %263 = vst [vmem:[%s502_s3] sm:$0xff] %v247_v33  ;;  %271 = vst [vmem:[%s502_s3 + $0x40] sm:$0xff] %v255_v34  ;;  %v248_v39 = vmax.f32 %v188_v35, 0.0  ;;  %v256_v40 = vmax.f32 %v220_v36, 0.0 }
  0xfc   :  { %266 = vst [vmem:[%s502_s3 + $0x18] sm:$0xff] %v250_v37  ;;  %274 = vst [vmem:[%s502_s3 + $0x58] sm:$0xff] %v258_v38 }
  0xfd   :  { %264 = vst [vmem:[%s502_s3 + $0x8] sm:$0xff] %v248_v39  ;;  %272 = vst [vmem:[%s502_s3 + $0x48] sm:$0xff] %v256_v40  ;;  %v338_v41 = vpop.f32.mrb[4].mxu0  ;;  %v346_v42 = vpop.f32.mrb[4].mxu1 }
  0xfe   :  { %v209_v43 = vadd.f32 %v338_v41, %v283_v16  ;;  %v241_v44 = vadd.f32 %v346_v42, %v283_v16  ;;  %v200_v45 = vpop.f32.mrb[5].mxu0  ;;  %v232_v46 = vpop.f32.mrb[5].mxu1 }
  0xff   :  { %v201_v47 = vadd.f32 %v283_v16, %v200_v45  ;;  %v233_v48 = vadd.f32 %v283_v16, %v232_v46  ;;  %v339_v49 = vpop.f32.mrb[6].mxu0  ;;  %v347_v50 = vpop.f32.mrb[6].mxu1 }
 0x100   :  { %v253_v51 = vmax.f32 %v209_v43, 0.0  ;;  %v261_v52 = vmax.f32 %v241_v44, 0.0  ;;  %v212_v53 = vadd.f32 %v339_v49, %v283_v16  ;;  %v244_v54 = vadd.f32 %v347_v50, %v283_v16  ;;  %v203_v55 = vpop.f32.mrb[7].mxu0  ;;  %v235_v56 = vpop.f32.mrb[7].mxu1 }
 0x101   :  { %v251_v57 = vmax.f32 %v201_v47, 0.0  ;;  %v259_v58 = vmax.f32 %v233_v48, 0.0  ;;  %v204_v59 = vadd.f32 %v283_v16, %v203_v55  ;;  %v236_v60 = vadd.f32 %v283_v16, %v235_v56 }
 0x102   :  { %269 = vst [vmem:[%s502_s3 + $0x30] sm:$0xff] %v253_v51  ;;  %277 = vst [vmem:[%s502_s3 + $0x70] sm:$0xff] %v261_v52  ;;  %v254_v61 = vmax.f32 %v212_v53, 0.0  ;;  %v262_v62 = vmax.f32 %v244_v54, 0.0 }
 0x103   :  { %267 = vst [vmem:[%s502_s3 + $0x20] sm:$0xff] %v251_v57  ;;  %275 = vst [vmem:[%s502_s3 + $0x60] sm:$0xff] %v259_v58  ;;  %v252_v63 = vmax.f32 %v204_v59, 0.0  ;;  %v260_v0 = vmax.f32 %v236_v60, 0.0 }
 0x104   :  { %270 = vst [vmem:[%s502_s3 + $0x38] sm:$0xff] %v254_v61  ;;  %278 = vst [vmem:[%s502_s3 + $0x78] sm:$0xff] %v262_v62 }
 0x105   :  { %268 = vst [vmem:[%s502_s3 + $0x28] sm:$0xff] %v252_v63  ;;  %276 = vst [vmem:[%s502_s3 + $0x68] sm:$0xff] %v260_v0 }

// kernel: _lambda_.7
= control target key start
LH: loop header
LB: loop body
LE: loop exit
PB: predicated region body
PF: predicated region fallthrough
CT: control target
= control target key end

     0   :  { %s717_s1 = inlined_call_operand.vmem [shape: bf16[256,128], index: 1, kind: input, shape index: {}]   ;;  %s718_s0 = inlined_call_operand.vmem [shape: bf16[128,256], index: 0, kind: input, shape index: {}]   ;;  %s719_s2 = inlined_call_operand.vmem [shape: f32[1,128], index: 2, kind: input, shape index: {}]   ;;  %s720_s3 = inlined_call_operand.vmem [shape: f32[128,128], index: 3, kind: output, shape index: {}]  }
   0x1   :  { %v492_v0 = vld [vmem:[%s717_s1 + $0x40] sm:$0xff]   ;;  %v494_v2 = vld [vmem:[%s717_s1 + $0x48] sm:$0xff]   ;;  %v496_v4 = vld [vmem:[%s717_s1 + $0x50] sm:$0xff]  }
   0x2   :  { %v493_v1 = vld [vmem:[%s717_s1] sm:$0xff]   ;;  %412 = vmatprep.subr.bf16.mxu0 %v492_v0  ;;  %476 = vmatprep.subr.bf16.mxu1 %v492_v0  ;;  %v495_v3 = vld [vmem:[%s717_s1 + $0x8] sm:$0xff]   ;;  %v497_v5 = vld [vmem:[%s717_s1 + $0x10] sm:$0xff]  }
   0x3   :  { %413 = vmatpush3.bf16.msra.mxu0 %v493_v1  ;;  %484 = vmatpush3.bf16.msra.mxu1 %v493_v1  ;;  %v498_v6 = vld [vmem:[%s717_s1 + $0x58] sm:$0xff]   ;;  %v500_v8 = vld [vmem:[%s717_s1 + $0x60] sm:$0xff]   ;;  %v502_v10 = vld [vmem:[%s717_s1 + $0x68] sm:$0xff]  }
   0x4   :  { %414 = vmatprep.subr.bf16.mxu0 %v494_v2  ;;  %477 = vmatprep.subr.bf16.mxu1 %v494_v2  ;;  %v499_v7 = vld [vmem:[%s717_s1 + $0x18] sm:$0xff]   ;;  %v501_v9 = vld [vmem:[%s717_s1 + $0x20] sm:$0xff]   ;;  %v503_v13 = vld [vmem:[%s717_s1 + $0x28] sm:$0xff]  }
   0x5   :  { %v510_v11 = vld [vmem:[%s718_s0 + $0x4] ss:$8 sps:$4 sm:$0xff]   ;;  %v504_v14 = vld [vmem:[%s717_s1 + $0x70] sm:$0xff]   ;;  %v506_v16 = vld [vmem:[%s717_s1 + $0x78] sm:$0xff]  }
   0x6   :  { %v513_v12 = vld [vmem:[%s718_s0 + $0x44] ss:$8 sps:$4 sm:$0xff]   ;;  %278 = vmatprep.mubr.bf16.mxu0 %v510_v11  ;;  %v505_v15 = vld [vmem:[%s717_s1 + $0x30] sm:$0xff]   ;;  %v507_v17 = vld [vmem:[%s717_s1 + $0x38] sm:$0xff]  }
   0x7   :  { %415 = vmatpush3.bf16.msra.mxu0 %v495_v3  ;;  %485 = vmatpush3.bf16.msra.mxu1 %v495_v3  ;;  %v508_v18 = vld [vmem:[%s718_s0] ss:$8 sps:$4 sm:$0xff]   ;;  %v514_v20 = vld [vmem:[%s718_s0 + $0x14] ss:$8 sps:$4 sm:$0xff]   ;;  %v518_v22 = vld [vmem:[%s718_s0 + $0x10] ss:$8 sps:$4 sm:$0xff]  }
   0x8   :  { %416 = vmatprep.subr.bf16.mxu0 %v496_v4  ;;  %478 = vmatprep.subr.bf16.mxu1 %v496_v4  ;;  %v511_v19 = vld [vmem:[%s718_s0 + $0x40] ss:$8 sps:$4 sm:$0xff]   ;;  %v516_v21 = vld [vmem:[%s718_s0 + $0x54] ss:$8 sps:$4 sm:$0xff]   ;;  %v519_v23 = vld [vmem:[%s718_s0 + $0x50] ss:$8 sps:$4 sm:$0xff]  }
   0x9   :  { %310 = vmatprep.mubr.bf16.mxu1 %v513_v12  ;;  %v520_v24 = vld [vmem:[%s718_s0 + $0x24] ss:$8 sps:$4 sm:$0xff]   ;;  %v524_v26 = vld [vmem:[%s718_s0 + $0x20] ss:$8 sps:$4 sm:$0xff]   ;;  %v526_v28 = vld [vmem:[%s718_s0 + $0x34] ss:$8 sps:$4 sm:$0xff]  }
   0xa   :  { %v522_v25 = vld [vmem:[%s718_s0 + $0x64] ss:$8 sps:$4 sm:$0xff]   ;;  %v525_v27 = vld [vmem:[%s718_s0 + $0x60] ss:$8 sps:$4 sm:$0xff]   ;;  %v528_v29 = vld [vmem:[%s718_s0 + $0x74] ss:$8 sps:$4 sm:$0xff]  }
   0xb   :  { %417 = vmatpush3.bf16.msra.mxu0 %v497_v5  ;;  %486 = vmatpush3.bf16.msra.mxu1 %v497_v5  ;;  %v530_v30 = vld [vmem:[%s718_s0 + $0x30] ss:$8 sps:$4 sm:$0xff]   ;;  %v651_v34 = vld [vmem:[%s719_s2] ss:$0 sm:$0xff] }
   0xc   :  { %418 = vmatprep.subr.bf16.mxu0 %v498_v6  ;;  %479 = vmatprep.subr.bf16.mxu1 %v498_v6  ;;  %v531_v31 = vld [vmem:[%s718_s0 + $0x70] ss:$8 sps:$4 sm:$0xff]  }
   0xf   :  { %419 = vmatpush3.bf16.msra.mxu0 %v499_v7  ;;  %487 = vmatpush3.bf16.msra.mxu1 %v499_v7 }
  0x10   :  { %420 = vmatprep.subr.bf16.mxu0 %v500_v8  ;;  %480 = vmatprep.subr.bf16.mxu1 %v500_v8 }
  0x13   :  { %421 = vmatpush3.bf16.msra.mxu0 %v501_v9  ;;  %488 = vmatpush3.bf16.msra.mxu1 %v501_v9 }
  0x14   :  { %422 = vmatprep.subr.bf16.mxu0 %v502_v10  ;;  %481 = vmatprep.subr.bf16.mxu1 %v502_v10 }
  0x17   :  { %423 = vmatpush3.bf16.msra.mxu0 %v503_v13  ;;  %489 = vmatpush3.bf16.msra.mxu1 %v503_v13 }
  0x18   :  { %424 = vmatprep.subr.bf16.mxu0 %v504_v14  ;;  %482 = vmatprep.subr.bf16.mxu1 %v504_v14 }
  0x1b   :  { %425 = vmatpush3.bf16.msra.mxu0 %v505_v15  ;;  %490 = vmatpush3.bf16.msra.mxu1 %v505_v15 }
  0x1c   :  { %426 = vmatprep.subr.bf16.mxu0 %v506_v16  ;;  %483 = vmatprep.subr.bf16.mxu1 %v506_v16 }
  0x1f   :  { %427 = vmatpush3.bf16.msra.mxu0 %v507_v17  ;;  %491 = vmatpush3.bf16.msra.mxu1 %v507_v17 }
  0x22   :  { %279 = vmatmul.mubr.bf16.vlgmr.msra.gmra.mrb[0].mxu0 %v508_v18  ;;  %311 = vmatmul.mubr.bf16.vlgmr.msra.gmra.mrb[0].mxu1 %v511_v19 }
  0x23   :  { %286 = vmatprep.mubr.bf16.mxu0 %v514_v20  ;;  %318 = vmatprep.mubr.bf16.mxu1 %v516_v21 }
  0x2a   :  { %287 = vmatmul.mubr.bf16.gmra.mrb[4].mxu0 %v518_v22  ;;  %319 = vmatmul.mubr.bf16.gmra.mrb[4].mxu1 %v519_v23 }
  0x2b   :  { %294 = vmatprep.mubr.bf16.mxu0 %v520_v24  ;;  %326 = vmatprep.mubr.bf16.mxu1 %v522_v25 }
  0x32   :  { %295 = vmatmul.mubr.bf16.gmra.mrb[8].mxu0 %v524_v26  ;;  %327 = vmatmul.mubr.bf16.gmra.mrb[8].mxu1 %v525_v27 }
  0x33   :  { %302 = vmatprep.mubr.bf16.mxu0 %v526_v28  ;;  %334 = vmatprep.mubr.bf16.mxu1 %v528_v29 }
  0x3a   :  { %303 = vmatmul.mubr.bf16.gmra.mrb[12].mxu0 %v530_v30  ;;  %335 = vmatmul.mubr.bf16.gmra.mrb[12].mxu1 %v531_v31 }
  0xf5   :  { %v428_v32 = vpop.f32.mrb[0].mxu0  ;;  %v452_v33 = vpop.f32.mrb[0].mxu1 }
  0xf6   :  { %v429_v35 = vpop.f32.mrb[1].mxu0  ;;  %v453_v36 = vpop.f32.mrb[1].mxu1 }
  0xf7   :  { %v430_v37 = vadd.f32 %v429_v35, %v428_v32  ;;  %v454_v38 = vadd.f32 %v453_v36, %v452_v33  ;;  %v431_v39 = vpop.f32.mrb[2].mxu0  ;;  %v455_v40 = vpop.f32.mrb[2].mxu1 }
  0xf8   :  { %v432_v41 = vpop.f32.mrb[3].mxu0  ;;  %v456_v42 = vpop.f32.mrb[3].mxu1 }
  0xf9   :  { %v281_v43 = vadd.f32 %v430_v37, %v651_v34  ;;  %v313_v44 = vadd.f32 %v454_v38, %v651_v34  ;;  %v433_v45 = vadd.f32 %v432_v41, %v431_v39  ;;  %v457_v46 = vadd.f32 %v456_v42, %v455_v40 }
  0xfb   :  { %v343_v47 = vmax.f32 %v281_v43, 0.0  ;;  %v351_v48 = vmax.f32 %v313_v44, 0.0  ;;  %v284_v49 = vadd.f32 %v433_v45, %v651_v34  ;;  %v316_v50 = vadd.f32 %v457_v46, %v651_v34 }
  0xfd   :  { %359 = vst [vmem:[%s720_s3] sm:$0xff] %v343_v47  ;;  %367 = vst [vmem:[%s720_s3 + $0x40] sm:$0xff] %v351_v48  ;;  %v344_v51 = vmax.f32 %v284_v49, 0.0  ;;  %v352_v52 = vmax.f32 %v316_v50, 0.0  ;;  %v434_v53 = vpop.f32.mrb[4].mxu0  ;;  %v458_v54 = vpop.f32.mrb[4].mxu1 }
  0xfe   :  { %v435_v55 = vpop.f32.mrb[5].mxu0  ;;  %v459_v56 = vpop.f32.mrb[5].mxu1 }
  0xff   :  { %360 = vst [vmem:[%s720_s3 + $0x8] sm:$0xff] %v344_v51  ;;  %368 = vst [vmem:[%s720_s3 + $0x48] sm:$0xff] %v352_v52  ;;  %v436_v57 = vadd.f32 %v435_v55, %v434_v53  ;;  %v460_v58 = vadd.f32 %v459_v56, %v458_v54  ;;  %v437_v59 = vpop.f32.mrb[6].mxu0  ;;  %v461_v60 = vpop.f32.mrb[6].mxu1 }
 0x100   :  { %v438_v61 = vpop.f32.mrb[7].mxu0  ;;  %v462_v62 = vpop.f32.mrb[7].mxu1 }
 0x101   :  { %v289_v63 = vadd.f32 %v436_v57, %v651_v34  ;;  %v321_v0 = vadd.f32 %v460_v58, %v651_v34  ;;  %v439_v1 = vadd.f32 %v438_v61, %v437_v59  ;;  %v463_v2 = vadd.f32 %v462_v62, %v461_v60 }
 0x103   :  { %v345_v3 = vmax.f32 %v289_v63, 0.0  ;;  %v353_v4 = vmax.f32 %v321_v0, 0.0  ;;  %v292_v5 = vadd.f32 %v439_v1, %v651_v34  ;;  %v324_v6 = vadd.f32 %v463_v2, %v651_v34 }
 0x105   :  { %361 = vst [vmem:[%s720_s3 + $0x10] sm:$0xff] %v345_v3  ;;  %369 = vst [vmem:[%s720_s3 + $0x50] sm:$0xff] %v353_v4  ;;  %v346_v7 = vmax.f32 %v292_v5, 0.0  ;;  %v354_v8 = vmax.f32 %v324_v6, 0.0  ;;  %v440_v9 = vpop.f32.mrb[8].mxu0  ;;  %v464_v10 = vpop.f32.mrb[8].mxu1 }
 0x106   :  { %v441_v11 = vpop.f32.mrb[9].mxu0  ;;  %v465_v12 = vpop.f32.mrb[9].mxu1 }
 0x107   :  { %362 = vst [vmem:[%s720_s3 + $0x18] sm:$0xff] %v346_v7  ;;  %370 = vst [vmem:[%s720_s3 + $0x58] sm:$0xff] %v354_v8  ;;  %v442_v13 = vadd.f32 %v441_v11, %v440_v9  ;;  %v466_v14 = vadd.f32 %v465_v12, %v464_v10  ;;  %v443_v15 = vpop.f32.mrb[10].mxu0  ;;  %v467_v16 = vpop.f32.mrb[10].mxu1 }
 0x108   :  { %v444_v17 = vpop.f32.mrb[11].mxu0  ;;  %v468_v18 = vpop.f32.mrb[11].mxu1 }
 0x109   :  { %v297_v19 = vadd.f32 %v442_v13, %v651_v34  ;;  %v329_v20 = vadd.f32 %v466_v14, %v651_v34  ;;  %v445_v21 = vadd.f32 %v444_v17, %v443_v15  ;;  %v469_v22 = vadd.f32 %v468_v18, %v467_v16 }
 0x10b   :  { %v347_v23 = vmax.f32 %v297_v19, 0.0  ;;  %v355_v24 = vmax.f32 %v329_v20, 0.0  ;;  %v300_v25 = vadd.f32 %v445_v21, %v651_v34  ;;  %v332_v26 = vadd.f32 %v469_v22, %v651_v34 }
 0x10d   :  { %363 = vst [vmem:[%s720_s3 + $0x20] sm:$0xff] %v347_v23  ;;  %371 = vst [vmem:[%s720_s3 + $0x60] sm:$0xff] %v355_v24  ;;  %v348_v27 = vmax.f32 %v300_v25, 0.0  ;;  %v356_v28 = vmax.f32 %v332_v26, 0.0  ;;  %v446_v29 = vpop.f32.mrb[12].mxu0  ;;  %v470_v30 = vpop.f32.mrb[12].mxu1 }
 0x10e   :  { %v447_v31 = vpop.f32.mrb[13].mxu0  ;;  %v471_v32 = vpop.f32.mrb[13].mxu1 }
 0x10f   :  { %364 = vst [vmem:[%s720_s3 + $0x28] sm:$0xff] %v348_v27  ;;  %372 = vst [vmem:[%s720_s3 + $0x68] sm:$0xff] %v356_v28  ;;  %v448_v33 = vadd.f32 %v447_v31, %v446_v29  ;;  %v472_v35 = vadd.f32 %v471_v32, %v470_v30  ;;  %v449_v36 = vpop.f32.mrb[14].mxu0  ;;  %v473_v37 = vpop.f32.mrb[14].mxu1 }
 0x110   :  { %v450_v38 = vpop.f32.mrb[15].mxu0  ;;  %v474_v39 = vpop.f32.mrb[15].mxu1 }
 0x111   :  { %v305_v40 = vadd.f32 %v448_v33, %v651_v34  ;;  %v337_v41 = vadd.f32 %v472_v35, %v651_v34  ;;  %v451_v42 = vadd.f32 %v450_v38, %v449_v36  ;;  %v475_v43 = vadd.f32 %v474_v39, %v473_v37 }
 0x113   :  { %v349_v44 = vmax.f32 %v305_v40, 0.0  ;;  %v357_v45 = vmax.f32 %v337_v41, 0.0  ;;  %v308_v46 = vadd.f32 %v451_v42, %v651_v34  ;;  %v340_v47 = vadd.f32 %v475_v43, %v651_v34 }
 0x115   :  { %365 = vst [vmem:[%s720_s3 + $0x30] sm:$0xff] %v349_v44  ;;  %373 = vst [vmem:[%s720_s3 + $0x70] sm:$0xff] %v357_v45  ;;  %v350_v48 = vmax.f32 %v308_v46, 0.0  ;;  %v358_v49 = vmax.f32 %v340_v47, 0.0 }
 0x117   :  { %366 = vst [vmem:[%s720_s3 + $0x38] sm:$0xff] %v350_v48  ;;  %374 = vst [vmem:[%s720_s3 + $0x78] sm:$0xff] %v358_v49 }

// kernel: _lambda_.8
= control target key start
LH: loop header
LB: loop body
LE: loop exit
PB: predicated region body
PF: predicated region fallthrough
CT: control target
= control target key end

     0   :  { %s354_s1 = inlined_call_operand.vmem [shape: bf16[256,128], index: 1, kind: input, shape index: {}]   ;;  %s355_s0 = inlined_call_operand.vmem [shape: bf16[16,256], index: 0, kind: input, shape index: {}]   ;;  %s356_s2 = inlined_call_operand.vmem [shape: f32[1,128], index: 2, kind: input, shape index: {}]   ;;  %s357_s3 = inlined_call_operand.vmem [shape: f32[16,128], index: 3, kind: output, shape index: {}]  }
   0x1   :  { %v252_v0 = vld [vmem:[%s354_s1 + $0x40] sm:$0xff]   ;;  %v254_v2 = vld [vmem:[%s354_s1 + $0x48] sm:$0xff]   ;;  %v256_v4 = vld [vmem:[%s354_s1 + $0x50] sm:$0xff]  }
   0x2   :  { %v253_v1 = vld [vmem:[%s354_s1] sm:$0xff]   ;;  %230 = vmatprep.subr.bf16.mxu0 %v252_v0  ;;  %v255_v3 = vld [vmem:[%s354_s1 + $0x8] sm:$0xff]   ;;  %v257_v5 = vld [vmem:[%s354_s1 + $0x10] sm:$0xff]  }
   0x3   :  { %231 = vmatpush3.bf16.msra.mxu0 %v253_v1  ;;  %v258_v6 = vld [vmem:[%s354_s1 + $0x58] sm:$0xff]   ;;  %v260_v8 = vld [vmem:[%s354_s1 + $0x60] sm:$0xff]   ;;  %v262_v10 = vld [vmem:[%s354_s1 + $0x68] sm:$0xff]  }
   0x4   :  { %232 = vmatprep.subr.bf16.mxu0 %v254_v2  ;;  %v259_v7 = vld [vmem:[%s354_s1 + $0x18] sm:$0xff]   ;;  %v261_v9 = vld [vmem:[%s354_s1 + $0x20] sm:$0xff]   ;;  %v263_v12 = vld [vmem:[%s354_s1 + $0x28] sm:$0xff]  }
   0x5   :  { %v270_v11 = vld [vmem:[%s355_s0 + $0x4] ss:$8 sps:$4 sm:$0xff]   ;;  %v264_v13 = vld [vmem:[%s354_s1 + $0x70] sm:$0xff]   ;;  %v266_v15 = vld [vmem:[%s354_s1 + $0x78] sm:$0xff]  }
   0x6   :  { %194 = vmatprep.mubr.bf16.mxu0 %v270_v11  ;;  %v265_v14 = vld [vmem:[%s354_s1 + $0x30] sm:$0xff]   ;;  %v267_v16 = vld [vmem:[%s354_s1 + $0x38] sm:$0xff]   ;;  %v268_v17 = vld [vmem:[%s355_s0] ss:$8 sps:$4 sm:$0xff]  }
   0x7   :  { %233 = vmatpush3.bf16.msra.mxu0 %v255_v3  ;;  %v211_v19 = vld [vmem:[%s356_s2] ss:$0 sm:$0xff] }
   0x8   :  { %234 = vmatprep.subr.bf16.mxu0 %v256_v4 }
   0xb   :  { %235 = vmatpush3.bf16.msra.mxu0 %v257_v5 }
   0xc   :  { %236 = vmatprep.subr.bf16.mxu0 %v258_v6 }
   0xf   :  { %237 = vmatpush3.bf16.msra.mxu0 %v259_v7 }
  0x10   :  { %238 = vmatprep.subr.bf16.mxu0 %v260_v8 }
  0x13   :  { %239 = vmatpush3.bf16.msra.mxu0 %v261_v9 }
  0x14   :  { %240 = vmatprep.subr.bf16.mxu0 %v262_v10 }
  0x17   :  { %241 = vmatpush3.bf16.msra.mxu0 %v263_v12 }
  0x18   :  { %242 = vmatprep.subr.bf16.mxu0 %v264_v13 }
  0x1b   :  { %243 = vmatpush3.bf16.msra.mxu0 %v265_v14 }
  0x1c   :  { %244 = vmatprep.subr.bf16.mxu0 %v266_v15 }
  0x1f   :  { %245 = vmatpush3.bf16.msra.mxu0 %v267_v16 }
  0x22   :  { %195 = vmatmul.mubr.bf16.vlgmr.msra.gmra.mrb[0].mxu0 %v268_v17 }
  0xf5   :  { %v246_v18 = vpop.f32.mrb[0].mxu0 }
  0xf6   :  { %v247_v20 = vpop.f32.mrb[1].mxu0 }
  0xf7   :  { %v248_v21 = vadd.f32 %v247_v20, %v246_v18  ;;  %v249_v22 = vpop.f32.mrb[2].mxu0 }
  0xf8   :  { %v250_v23 = vpop.f32.mrb[3].mxu0 }
  0xf9   :  { %v197_v24 = vadd.f32 %v248_v21, %v211_v19  ;;  %v251_v25 = vadd.f32 %v250_v23, %v249_v22 }
  0xfb   :  { %v203_v26 = vmax.f32 %v197_v24, 0.0  ;;  %v200_v27 = vadd.f32 %v251_v25, %v211_v19 }
  0xfd   :  { %205 = vst [vmem:[%s357_s3] sm:$0xff] %v203_v26  ;;  %v204_v28 = vmax.f32 %v200_v27, 0.0 }
  0xff   :  { %206 = vst [vmem:[%s357_s3 + $0x8] sm:$0xff] %v204_v28 }

// kernel: _lambda_.10
= control target key start
LH: loop header
LB: loop body
LE: loop exit
PB: predicated region body
PF: predicated region fallthrough
CT: control target
= control target key end

     0   :  { %s805_s1 = inlined_call_operand.vmem [shape: bf16[256,128], index: 1, kind: input, shape index: {}]   ;;  %s806_s0 = inlined_call_operand.vmem [shape: bf16[128,256], index: 0, kind: input, shape index: {}]   ;;  %s807_s2 = inlined_call_operand.vmem [shape: f32[1,128], index: 2, kind: input, shape index: {}]   ;;  %s808_s3 = inlined_call_operand.vmem [shape: f32[128,128], index: 3, kind: input, shape index: {}]   ;;  %s809_s4 = inlined_call_operand.vmem [shape: f32[128,128], index: 4, kind: output, shape index: {}]  }
   0x1   :  { %v527_v0 = vld [vmem:[%s805_s1 + $0x40] sm:$0xff]   ;;  %v529_v2 = vld [vmem:[%s805_s1 + $0x48] sm:$0xff]   ;;  %v531_v4 = vld [vmem:[%s805_s1 + $0x50] sm:$0xff]  }
   0x2   :  { %v528_v1 = vld [vmem:[%s805_s1] sm:$0xff]   ;;  %447 = vmatprep.subr.bf16.mxu0 %v527_v0  ;;  %511 = vmatprep.subr.bf16.mxu1 %v527_v0  ;;  %v530_v3 = vld [vmem:[%s805_s1 + $0x8] sm:$0xff]   ;;  %v532_v5 = vld [vmem:[%s805_s1 + $0x10] sm:$0xff]  }
   0x3   :  { %448 = vmatpush3.bf16.msra.mxu0 %v528_v1  ;;  %519 = vmatpush3.bf16.msra.mxu1 %v528_v1  ;;  %v533_v6 = vld [vmem:[%s805_s1 + $0x58] sm:$0xff]   ;;  %v535_v8 = vld [vmem:[%s805_s1 + $0x60] sm:$0xff]   ;;  %v537_v10 = vld [vmem:[%s805_s1 + $0x68] sm:$0xff]  }
   0x4   :  { %449 = vmatprep.subr.bf16.mxu0 %v529_v2  ;;  %512 = vmatprep.subr.bf16.mxu1 %v529_v2  ;;  %v534_v7 = vld [vmem:[%s805_s1 + $0x18] sm:$0xff]   ;;  %v536_v9 = vld [vmem:[%s805_s1 + $0x20] sm:$0xff]   ;;  %v538_v13 = vld [vmem:[%s805_s1 + $0x28] sm:$0xff]  }
   0x5   :  { %v545_v11 = vld [vmem:[%s806_s0 + $0x4] ss:$8 sps:$4 sm:$0xff]   ;;  %v539_v14 = vld [vmem:[%s805_s1 + $0x70] sm:$0xff]   ;;  %v541_v16 = vld [vmem:[%s805_s1 + $0x78] sm:$0xff]  }
   0x6   :  { %v548_v12 = vld [vmem:[%s806_s0 + $0x44] ss:$8 sps:$4 sm:$0xff]   ;;  %281 = vmatprep.mubr.bf16.mxu0 %v545_v11  ;;  %v540_v15 = vld [vmem:[%s805_s1 + $0x30] sm:$0xff]   ;;  %v542_v17 = vld [vmem:[%s805_s1 + $0x38] sm:$0xff]  }
   0x7   :  { %450 = vmatpush3.bf16.msra.mxu0 %v530_v3  ;;  %520 = vmatpush3.bf16.msra.mxu1 %v530_v3  ;;  %v543_v18 = vld [vmem:[%s806_s0] ss:$8 sps:$4 sm:$0xff]   ;;  %v549_v20 = vld [vmem:[%s806_s0 + $0x14] ss:$8 sps:$4 sm:$0xff]   ;;  %v553_v22 = vld [vmem:[%s806_s0 + $0x10] ss:$8 sps:$4 sm:$0xff]  }
   0x8   :  { %451 = vmatprep.subr.bf16.mxu0 %v531_v4  ;;  %513 = vmatprep.subr.bf16.mxu1 %v531_v4  ;;  %v546_v19 = vld [vmem:[%s806_s0 + $0x40] ss:$8 sps:$4 sm:$0xff]   ;;  %v551_v21 = vld [vmem:[%s806_s0 + $0x54] ss:$8 sps:$4 sm:$0xff]   ;;  %v554_v23 = vld [vmem:[%s806_s0 + $0x50] ss:$8 sps:$4 sm:$0xff]  }
   0x9   :  { %313 = vmatprep.mubr.bf16.mxu1 %v548_v12  ;;  %v555_v24 = vld [vmem:[%s806_s0 + $0x24] ss:$8 sps:$4 sm:$0xff]   ;;  %v559_v26 = vld [vmem:[%s806_s0 + $0x20] ss:$8 sps:$4 sm:$0xff]   ;;  %v561_v28 = vld [vmem:[%s806_s0 + $0x34] ss:$8 sps:$4 sm:$0xff]  }
   0xa   :  { %v557_v25 = vld [vmem:[%s806_s0 + $0x64] ss:$8 sps:$4 sm:$0xff]   ;;  %v560_v27 = vld [vmem:[%s806_s0 + $0x60] ss:$8 sps:$4 sm:$0xff]   ;;  %v563_v29 = vld [vmem:[%s806_s0 + $0x74] ss:$8 sps:$4 sm:$0xff]  }
   0xb   :  { %452 = vmatpush3.bf16.msra.mxu0 %v532_v5  ;;  %521 = vmatpush3.bf16.msra.mxu1 %v532_v5  ;;  %v565_v30 = vld [vmem:[%s806_s0 + $0x30] ss:$8 sps:$4 sm:$0xff]   ;;  %v691_v34 = vld [vmem:[%s807_s2] ss:$0 sm:$0xff]  ;;  %v347_v49 = vld [vmem:[%s808_s3 + $0x8] sm:$0xff] }
   0xc   :  { %453 = vmatprep.subr.bf16.mxu0 %v533_v6  ;;  %514 = vmatprep.subr.bf16.mxu1 %v533_v6  ;;  %v566_v31 = vld [vmem:[%s806_s0 + $0x70] ss:$8 sps:$4 sm:$0xff]   ;;  %v346_v41 = vld [vmem:[%s808_s3] sm:$0xff]  ;;  %v355_v50 = vld [vmem:[%s808_s3 + $0x48] sm:$0xff] }
   0xd   :  { %v354_v42 = vld [vmem:[%s808_s3 + $0x40] sm:$0xff]  ;;  %v348_v5 = vld [vmem:[%s808_s3 + $0x10] sm:$0xff] }
   0xe   :  { %v356_v6 = vld [vmem:[%s808_s3 + $0x50] sm:$0xff] }
   0xf   :  { %454 = vmatpush3.bf16.msra.mxu0 %v534_v7  ;;  %522 = vmatpush3.bf16.msra.mxu1 %v534_v7 }
  0x10   :  { %455 = vmatprep.subr.bf16.mxu0 %v535_v8  ;;  %515 = vmatprep.subr.bf16.mxu1 %v535_v8 }
  0x13   :  { %456 = vmatpush3.bf16.msra.mxu0 %v536_v9  ;;  %523 = vmatpush3.bf16.msra.mxu1 %v536_v9 }
  0x14   :  { %457 = vmatprep.subr.bf16.mxu0 %v537_v10  ;;  %516 = vmatprep.subr.bf16.mxu1 %v537_v10 }
  0x17   :  { %458 = vmatpush3.bf16.msra.mxu0 %v538_v13  ;;  %524 = vmatpush3.bf16.msra.mxu1 %v538_v13  ;;  %v349_v13 = vld [vmem:[%s808_s3 + $0x18] sm:$0xff] }
  0x18   :  { %459 = vmatprep.subr.bf16.mxu0 %v539_v14  ;;  %517 = vmatprep.subr.bf16.mxu1 %v539_v14  ;;  %v357_v14 = vld [vmem:[%s808_s3 + $0x58] sm:$0xff] }
  0x1b   :  { %460 = vmatpush3.bf16.msra.mxu0 %v540_v15  ;;  %525 = vmatpush3.bf16.msra.mxu1 %v540_v15 }
  0x1c   :  { %461 = vmatprep.subr.bf16.mxu0 %v541_v16  ;;  %518 = vmatprep.subr.bf16.mxu1 %v541_v16 }
  0x1f   :  { %462 = vmatpush3.bf16.msra.mxu0 %v542_v17  ;;  %526 = vmatpush3.bf16.msra.mxu1 %v542_v17 }
  0x22   :  { %282 = vmatmul.mubr.bf16.vlgmr.msra.gmra.mrb[0].mxu0 %v543_v18  ;;  %314 = vmatmul.mubr.bf16.vlgmr.msra.gmra.mrb[0].mxu1 %v546_v19 }
  0x23   :  { %289 = vmatprep.mubr.bf16.mxu0 %v549_v20  ;;  %321 = vmatprep.mubr.bf16.mxu1 %v551_v21 }
  0x2a   :  { %290 = vmatmul.mubr.bf16.gmra.mrb[4].mxu0 %v553_v22  ;;  %322 = vmatmul.mubr.bf16.gmra.mrb[4].mxu1 %v554_v23 }
  0x2b   :  { %297 = vmatprep.mubr.bf16.mxu0 %v555_v24  ;;  %329 = vmatprep.mubr.bf16.mxu1 %v557_v25 }
  0x32   :  { %298 = vmatmul.mubr.bf16.gmra.mrb[8].mxu0 %v559_v26  ;;  %330 = vmatmul.mubr.bf16.gmra.mrb[8].mxu1 %v560_v27 }
  0x33   :  { %305 = vmatprep.mubr.bf16.mxu0 %v561_v28  ;;  %337 = vmatprep.mubr.bf16.mxu1 %v563_v29 }
  0x3a   :  { %306 = vmatmul.mubr.bf16.gmra.mrb[12].mxu0 %v565_v30  ;;  %338 = vmatmul.mubr.bf16.gmra.mrb[12].mxu1 %v566_v31 }
  0xf5   :  { %v463_v32 = vpop.f32.mrb[0].mxu0  ;;  %v487_v33 = vpop.f32.mrb[0].mxu1 }
  0xf6   :  { %v464_v35 = vpop.f32.mrb[1].mxu0  ;;  %v488_v36 = vpop.f32.mrb[1].mxu1 }
  0xf7   :  { %v465_v37 = vadd.f32 %v464_v35, %v463_v32  ;;  %v489_v38 = vadd.f32 %v488_v36, %v487_v33  ;;  %v466_v39 = vpop.f32.mrb[2].mxu0  ;;  %v490_v40 = vpop.f32.mrb[2].mxu1  ;;  %v350_v33 = vld [vmem:[%s808_s3 + $0x20] sm:$0xff] }
  0xf8   :  { %v467_v43 = vpop.f32.mrb[3].mxu0  ;;  %v491_v44 = vpop.f32.mrb[3].mxu1  ;;  %v358_v35 = vld [vmem:[%s808_s3 + $0x60] sm:$0xff] }
  0xf9   :  { %v284_v45 = vadd.f32 %v465_v37, %v691_v34  ;;  %v316_v46 = vadd.f32 %v489_v38, %v691_v34  ;;  %v468_v47 = vadd.f32 %v467_v43, %v466_v39  ;;  %v492_v48 = vadd.f32 %v491_v44, %v490_v40  ;;  %v359_v43 = vld [vmem:[%s808_s3 + $0x68] sm:$0xff] }
  0xfb   :  { %v362_v51 = vadd.f32 %v346_v41, %v284_v45  ;;  %v370_v52 = vadd.f32 %v354_v42, %v316_v46  ;;  %v287_v53 = vadd.f32 %v468_v47, %v691_v34  ;;  %v319_v54 = vadd.f32 %v492_v48, %v691_v34  ;;  %v351_v42 = vld [vmem:[%s808_s3 + $0x28] sm:$0xff] }
  0xfd   :  { %v378_v55 = vmax.f32 %v362_v51, 0.0  ;;  %v386_v56 = vmax.f32 %v370_v52, 0.0  ;;  %v363_v57 = vadd.f32 %v347_v49, %v287_v53  ;;  %v371_v58 = vadd.f32 %v355_v50, %v319_v54  ;;  %v469_v59 = vpop.f32.mrb[4].mxu0  ;;  %v493_v60 = vpop.f32.mrb[4].mxu1 }
  0xfe   :  { %v470_v61 = vpop.f32.mrb[5].mxu0  ;;  %v494_v62 = vpop.f32.mrb[5].mxu1 }
  0xff   :  { %394 = vst [vmem:[%s809_s4] sm:$0xff] %v378_v55  ;;  %402 = vst [vmem:[%s809_s4 + $0x40] sm:$0xff] %v386_v56  ;;  %v379_v63 = vmax.f32 %v363_v57, 0.0  ;;  %v387_v0 = vmax.f32 %v371_v58, 0.0  ;;  %v471_v1 = vadd.f32 %v470_v61, %v469_v59  ;;  %v495_v2 = vadd.f32 %v494_v62, %v493_v60  ;;  %v472_v3 = vpop.f32.mrb[6].mxu0  ;;  %v496_v4 = vpop.f32.mrb[6].mxu1  ;;  %v352_v62 = vld [vmem:[%s808_s3 + $0x30] sm:$0xff] }
 0x100   :  { %v473_v7 = vpop.f32.mrb[7].mxu0  ;;  %v497_v8 = vpop.f32.mrb[7].mxu1 }
 0x101   :  { %395 = vst [vmem:[%s809_s4 + $0x8] sm:$0xff] %v379_v63  ;;  %403 = vst [vmem:[%s809_s4 + $0x48] sm:$0xff] %v387_v0  ;;  %v292_v9 = vadd.f32 %v471_v1, %v691_v34  ;;  %v324_v10 = vadd.f32 %v495_v2, %v691_v34  ;;  %v474_v11 = vadd.f32 %v473_v7, %v472_v3  ;;  %v360_v63 = vld [vmem:[%s808_s3 + $0x70] sm:$0xff]  ;;  %v361_v7 = vld [vmem:[%s808_s3 + $0x78] sm:$0xff] }
 0x102   :  { %v498_v12 = vadd.f32 %v497_v8, %v496_v4 }
 0x103   :  { %v364_v15 = vadd.f32 %v348_v5, %v292_v9  ;;  %v372_v16 = vadd.f32 %v356_v6, %v324_v10  ;;  %v295_v17 = vadd.f32 %v474_v11, %v691_v34  ;;  %v353_v6 = vld [vmem:[%s808_s3 + $0x38] sm:$0xff] }
 0x104   :  { %v327_v18 = vadd.f32 %v498_v12, %v691_v34 }
 0x105   :  { %v380_v19 = vmax.f32 %v364_v15, 0.0  ;;  %v388_v20 = vmax.f32 %v372_v16, 0.0  ;;  %v365_v21 = vadd.f32 %v349_v13, %v295_v17  ;;  %v475_v23 = vpop.f32.mrb[8].mxu0  ;;  %v499_v24 = vpop.f32.mrb[8].mxu1 }
 0x106   :  { %v373_v22 = vadd.f32 %v357_v14, %v327_v18  ;;  %v476_v25 = vpop.f32.mrb[9].mxu0  ;;  %v500_v26 = vpop.f32.mrb[9].mxu1 }
 0x107   :  { %396 = vst [vmem:[%s809_s4 + $0x10] sm:$0xff] %v380_v19  ;;  %404 = vst [vmem:[%s809_s4 + $0x50] sm:$0xff] %v388_v20  ;;  %v381_v27 = vmax.f32 %v365_v21, 0.0  ;;  %v477_v29 = vadd.f32 %v476_v25, %v475_v23  ;;  %v501_v30 = vadd.f32 %v500_v26, %v499_v24  ;;  %v478_v31 = vpop.f32.mrb[10].mxu0  ;;  %v502_v32 = vpop.f32.mrb[10].mxu1 }
 0x108   :  { %v389_v28 = vmax.f32 %v373_v22, 0.0  ;;  %v479_v36 = vpop.f32.mrb[11].mxu0  ;;  %v503_v37 = vpop.f32.mrb[11].mxu1 }
 0x109   :  { %397 = vst [vmem:[%s809_s4 + $0x18] sm:$0xff] %v381_v27  ;;  %v300_v38 = vadd.f32 %v477_v29, %v691_v34  ;;  %v332_v39 = vadd.f32 %v501_v30, %v691_v34  ;;  %v480_v40 = vadd.f32 %v479_v36, %v478_v31  ;;  %v504_v41 = vadd.f32 %v503_v37, %v502_v32 }
 0x10a   :  { %405 = vst [vmem:[%s809_s4 + $0x58] sm:$0xff] %v389_v28 }
 0x10b   :  { %v366_v44 = vadd.f32 %v350_v33, %v300_v38  ;;  %v374_v45 = vadd.f32 %v358_v35, %v332_v39  ;;  %v303_v46 = vadd.f32 %v480_v40, %v691_v34  ;;  %v335_v47 = vadd.f32 %v504_v41, %v691_v34 }
 0x10d   :  { %v382_v48 = vmax.f32 %v366_v44, 0.0  ;;  %v390_v49 = vmax.f32 %v374_v45, 0.0  ;;  %v367_v50 = vadd.f32 %v351_v42, %v303_v46  ;;  %v375_v51 = vadd.f32 %v359_v43, %v335_v47  ;;  %v481_v52 = vpop.f32.mrb[12].mxu0  ;;  %v505_v53 = vpop.f32.mrb[12].mxu1 }
 0x10e   :  { %v482_v54 = vpop.f32.mrb[13].mxu0  ;;  %v506_v55 = vpop.f32.mrb[13].mxu1 }
 0x10f   :  { %398 = vst [vmem:[%s809_s4 + $0x20] sm:$0xff] %v382_v48  ;;  %406 = vst [vmem:[%s809_s4 + $0x60] sm:$0xff] %v390_v49  ;;  %v383_v56 = vmax.f32 %v367_v50, 0.0  ;;  %v391_v57 = vmax.f32 %v375_v51, 0.0  ;;  %v483_v58 = vadd.f32 %v482_v54, %v481_v52  ;;  %v507_v59 = vadd.f32 %v506_v55, %v505_v53  ;;  %v484_v60 = vpop.f32.mrb[14].mxu0  ;;  %v508_v61 = vpop.f32.mrb[14].mxu1 }
 0x110   :  { %v485_v0 = vpop.f32.mrb[15].mxu0  ;;  %v509_v1 = vpop.f32.mrb[15].mxu1 }
 0x111   :  { %399 = vst [vmem:[%s809_s4 + $0x28] sm:$0xff] %v383_v56  ;;  %407 = vst [vmem:[%s809_s4 + $0x68] sm:$0xff] %v391_v57  ;;  %v308_v2 = vadd.f32 %v483_v58, %v691_v34  ;;  %v340_v3 = vadd.f32 %v507_v59, %v691_v34  ;;  %v486_v4 = vadd.f32 %v485_v0, %v484_v60 }
 0x112   :  { %v510_v5 = vadd.f32 %v509_v1, %v508_v61 }
 0x113   :  { %v368_v8 = vadd.f32 %v352_v62, %v308_v2  ;;  %v376_v9 = vadd.f32 %v360_v63, %v340_v3  ;;  %v311_v10 = vadd.f32 %v486_v4, %v691_v34 }
 0x114   :  { %v343_v11 = vadd.f32 %v510_v5, %v691_v34 }
 0x115   :  { %v384_v12 = vmax.f32 %v368_v8, 0.0  ;;  %v392_v13 = vmax.f32 %v376_v9, 0.0  ;;  %v369_v14 = vadd.f32 %v353_v6, %v311_v10 }
 0x116   :  { %v377_v15 = vadd.f32 %v361_v7, %v343_v11 }
 0x117   :  { %400 = vst [vmem:[%s809_s4 + $0x30] sm:$0xff] %v384_v12  ;;  %408 = vst [vmem:[%s809_s4 + $0x70] sm:$0xff] %v392_v13  ;;  %v385_v16 = vmax.f32 %v369_v14, 0.0 }
 0x118   :  { %v393_v17 = vmax.f32 %v377_v15, 0.0 }
 0x119   :  { %401 = vst [vmem:[%s809_s4 + $0x38] sm:$0xff] %v385_v16 }
 0x11a   :  { %409 = vst [vmem:[%s809_s4 + $0x78] sm:$0xff] %v393_v17 }

// kernel: _lambda_.11
= control target key start
LH: loop header
LB: loop body
LE: loop exit
PB: predicated region body
PF: predicated region fallthrough
CT: control target
= control target key end

     0   :  { %v1982_v0 = vmov 0   ;;  %s2977_s1 = inlined_call_operand.vmem [shape: bf16[256,128], index: 1, kind: input, shape index: {}]   ;;  %s2978_s0 = inlined_call_operand.vmem [shape: bf16[1024,256], index: 0, kind: input, shape index: {}]   ;;  %s2979_s2 = inlined_call_operand.vmem [shape: f32[1,128], index: 2, kind: input, shape index: {}]   ;;  %s2980_s3 = inlined_call_operand.vmem [shape: f32[1024,128], index: 3, kind: output, shape index: {}]  }
   0x1   :  { %918 = vmatprep.subr.bf16.mxu0 %v1982_v0  ;;  %1740 = vmatprep.subr.bf16.mxu1 %v1982_v0  ;;  %v1773_v1 = vld [vmem:[%s2977_s1] sm:$0xff]   ;;  %v1774_v2 = vld [vmem:[%s2977_s1 + $0x8] sm:$0xff]   ;;  %v1775_v3 = vld [vmem:[%s2977_s1 + $0x10] sm:$0xff]  }
   0x2   :  { %919 = vmatpush1.bf16.msra.mxu0 %v1773_v1  ;;  %1756 = vmatpush1.bf16.msra.mxu1 %v1773_v1  ;;  %v1776_v4 = vld [vmem:[%s2977_s1 + $0x18] sm:$0xff]   ;;  %v1777_v5 = vld [vmem:[%s2977_s1 + $0x20] sm:$0xff]   ;;  %v1778_v7 = vld [vmem:[%s2977_s1 + $0x28] sm:$0xff]  }
   0x3   :  { %920 = vmatprep.subr.bf16.mxu0 %v1982_v0  ;;  %1741 = vmatprep.subr.bf16.mxu1 %v1982_v0  ;;  %v1791_v6 = vld [vmem:[%s2978_s0 + $0x4] ss:$8 sps:$4 sm:$0xff]   ;;  %v1779_v9 = vld [vmem:[%s2977_s1 + $0x30] sm:$0xff]   ;;  %v1780_v10 = vld [vmem:[%s2977_s1 + $0x38] sm:$0xff]  }
   0x4   :  { %v1794_v8 = vld [vmem:[%s2978_s0 + $0x204] ss:$8 sps:$4 sm:$0xff]   ;;  %950 = vmatprep.mubr.bf16.mxu0 %v1791_v6  ;;  %v1783_v13 = vld [vmem:[%s2977_s1 + $0x50] sm:$0xff]   ;;  %v1784_v14 = vld [vmem:[%s2977_s1 + $0x58] sm:$0xff]  }
   0x5   :  { %1206 = vmatprep.mubr.bf16.mxu1 %v1794_v8  ;;  %v1781_v11 = vld [vmem:[%s2977_s1 + $0x40] sm:$0xff]   ;;  %v1782_v12 = vld [vmem:[%s2977_s1 + $0x48] sm:$0xff]   ;;  %v1787_v17 = vld [vmem:[%s2977_s1 + $0x70] sm:$0xff]  }
   0x6   :  { %921 = vmatpush1.bf16.msra.mxu0 %v1774_v2  ;;  %1757 = vmatpush1.bf16.msra.mxu1 %v1774_v2  ;;  %v1785_v15 = vld [vmem:[%s2977_s1 + $0x60] sm:$0xff]   ;;  %v1786_v16 = vld [vmem:[%s2977_s1 + $0x68] sm:$0xff]   ;;  %v1788_v18 = vld [vmem:[%s2977_s1 + $0x78] sm:$0xff]  }
   0x7   :  { %922 = vmatprep.subr.bf16.mxu0 %v1982_v0  ;;  %1742 = vmatprep.subr.bf16.mxu1 %v1982_v0  ;;  %v1789_v19 = vld [vmem:[%s2978_s0] ss:$8 sps:$4 sm:$0xff]   ;;  %v1795_v21 = vld [vmem:[%s2978_s0 + $0x14] ss:$8 sps:$4 sm:$0xff]   ;;  %v1799_v23 = vld [vmem:[%s2978_s0 + $0x10] ss:$8 sps:$4 sm:$0xff]  }
   0x8   :  { %v1792_v20 = vld [vmem:[%s2978_s0 + $0x200] ss:$8 sps:$4 sm:$0xff]   ;;  %v1797_v22 = vld [vmem:[%s2978_s0 + $0x214] ss:$8 sps:$4 sm:$0xff]   ;;  %v1800_v24 = vld [vmem:[%s2978_s0 + $0x210] ss:$8 sps:$4 sm:$0xff]  }
   0x9   :  { %v1801_v25 = vld [vmem:[%s2978_s0 + $0x24] ss:$8 sps:$4 sm:$0xff]   ;;  %v1805_v27 = vld [vmem:[%s2978_s0 + $0x20] ss:$8 sps:$4 sm:$0xff]   ;;  %v1807_v29 = vld [vmem:[%s2978_s0 + $0x34] ss:$8 sps:$4 sm:$0xff]  }
   0xa   :  { %923 = vmatpush1.bf16.msra.mxu0 %v1775_v3  ;;  %1758 = vmatpush1.bf16.msra.mxu1 %v1775_v3  ;;  %v1803_v26 = vld [vmem:[%s2978_s0 + $0x224] ss:$8 sps:$4 sm:$0xff]   ;;  %v1806_v28 = vld [vmem:[%s2978_s0 + $0x220] ss:$8 sps:$4 sm:$0xff]   ;;  %v1809_v30 = vld [vmem:[%s2978_s0 + $0x234] ss:$8 sps:$4 sm:$0xff]  }
   0xb   :  { %924 = vmatprep.subr.bf16.mxu0 %v1982_v0  ;;  %1743 = vmatprep.subr.bf16.mxu1 %v1982_v0  ;;  %v1811_v31 = vld [vmem:[%s2978_s0 + $0x30] ss:$8 sps:$4 sm:$0xff]   ;;  %v1813_v33 = vld [vmem:[%s2978_s0 + $0x44] ss:$8 sps:$4 sm:$0xff]   ;;  %v1817_v35 = vld [vmem:[%s2978_s0 + $0x40] ss:$8 sps:$4 sm:$0xff]  }
   0xc   :  { %v1812_v32 = vld [vmem:[%s2978_s0 + $0x230] ss:$8 sps:$4 sm:$0xff]   ;;  %v1815_v34 = vld [vmem:[%s2978_s0 + $0x244] ss:$8 sps:$4 sm:$0xff]   ;;  %v1818_v36 = vld [vmem:[%s2978_s0 + $0x240] ss:$8 sps:$4 sm:$0xff]  }
   0xd   :  { %v1819_v37 = vld [vmem:[%s2978_s0 + $0x54] ss:$8 sps:$4 sm:$0xff]   ;;  %v1823_v39 = vld [vmem:[%s2978_s0 + $0x50] ss:$8 sps:$4 sm:$0xff]   ;;  %v1825_v41 = vld [vmem:[%s2978_s0 + $0x64] ss:$8 sps:$4 sm:$0xff]  }
   0xe   :  { %925 = vmatpush1.bf16.msra.mxu0 %v1776_v4  ;;  %1759 = vmatpush1.bf16.msra.mxu1 %v1776_v4  ;;  %v1821_v38 = vld [vmem:[%s2978_s0 + $0x254] ss:$8 sps:$4 sm:$0xff]   ;;  %v1824_v40 = vld [vmem:[%s2978_s0 + $0x250] ss:$8 sps:$4 sm:$0xff]   ;;  %v1827_v42 = vld [vmem:[%s2978_s0 + $0x264] ss:$8 sps:$4 sm:$0xff]  }
   0xf   :  { %926 = vmatprep.subr.bf16.mxu0 %v1982_v0  ;;  %1744 = vmatprep.subr.bf16.mxu1 %v1982_v0  ;;  %v1829_v43 = vld [vmem:[%s2978_s0 + $0x60] ss:$8 sps:$4 sm:$0xff]   ;;  %v1831_v45 = vld [vmem:[%s2978_s0 + $0x74] ss:$8 sps:$4 sm:$0xff]   ;;  %v1835_v47 = vld [vmem:[%s2978_s0 + $0x70] ss:$8 sps:$4 sm:$0xff]  }
  0x10   :  { %v1830_v44 = vld [vmem:[%s2978_s0 + $0x260] ss:$8 sps:$4 sm:$0xff]   ;;  %v1833_v46 = vld [vmem:[%s2978_s0 + $0x274] ss:$8 sps:$4 sm:$0xff]   ;;  %v1836_v48 = vld [vmem:[%s2978_s0 + $0x270] ss:$8 sps:$4 sm:$0xff]  }
  0x11   :  { %v1837_v49 = vld [vmem:[%s2978_s0 + $0x84] ss:$8 sps:$4 sm:$0xff]   ;;  %v1841_v51 = vld [vmem:[%s2978_s0 + $0x80] ss:$8 sps:$4 sm:$0xff]   ;;  %v1843_v53 = vld [vmem:[%s2978_s0 + $0x94] ss:$8 sps:$4 sm:$0xff]  }
  0x12   :  { %927 = vmatpush1.bf16.msra.mxu0 %v1777_v5  ;;  %1760 = vmatpush1.bf16.msra.mxu1 %v1777_v5  ;;  %v1839_v50 = vld [vmem:[%s2978_s0 + $0x284] ss:$8 sps:$4 sm:$0xff]   ;;  %v1842_v52 = vld [vmem:[%s2978_s0 + $0x280] ss:$8 sps:$4 sm:$0xff]   ;;  %v1845_v54 = vld [vmem:[%s2978_s0 + $0x294] ss:$8 sps:$4 sm:$0xff]  }
  0x13   :  { %928 = vmatprep.subr.bf16.mxu0 %v1982_v0  ;;  %1745 = vmatprep.subr.bf16.mxu1 %v1982_v0  ;;  %v1847_v55 = vld [vmem:[%s2978_s0 + $0x90] ss:$8 sps:$4 sm:$0xff]   ;;  %v1849_v57 = vld [vmem:[%s2978_s0 + $0xa4] ss:$8 sps:$4 sm:$0xff]   ;;  %v1853_v59 = vld [vmem:[%s2978_s0 + $0xa0] ss:$8 sps:$4 sm:$0xff]  }
  0x14   :  { %v1848_v56 = vld [vmem:[%s2978_s0 + $0x290] ss:$8 sps:$4 sm:$0xff]   ;;  %v1851_v58 = vld [vmem:[%s2978_s0 + $0x2a4] ss:$8 sps:$4 sm:$0xff]   ;;  %v1854_v60 = vld [vmem:[%s2978_s0 + $0x2a0] ss:$8 sps:$4 sm:$0xff]  }
  0x15   :  { %v1855_v61 = vld [vmem:[%s2978_s0 + $0xb4] ss:$8 sps:$4 sm:$0xff]   ;;  %v1859_v63 = vld [vmem:[%s2978_s0 + $0xb0] ss:$8 sps:$4 sm:$0xff]   ;;  %v1861_v1 = vld [vmem:[%s2978_s0 + $0xc4] ss:$8 sps:$4 sm:$0xff]  }
  0x16   :  { %929 = vmatpush1.bf16.msra.mxu0 %v1778_v7  ;;  %1761 = vmatpush1.bf16.msra.mxu1 %v1778_v7  ;;  %v1857_v62 = vld [vmem:[%s2978_s0 + $0x2b4] ss:$8 sps:$4 sm:$0xff]   ;;  %v1863_v2 = vld [vmem:[%s2978_s0 + $0x2c4] ss:$8 sps:$4 sm:$0xff]   ;;  %v1865_v3 = vld [vmem:[%s2978_s0 + $0xc0] ss:$8 sps:$4 sm:$0xff]  }
  0x17   :  { %930 = vmatprep.subr.bf16.mxu0 %v1982_v0  ;;  %1746 = vmatprep.subr.bf16.mxu1 %v1982_v0  ;;  %v1866_v4 = vld [vmem:[%s2978_s0 + $0x2c0] ss:$8 sps:$4 sm:$0xff]   ;;  %v1867_v5 = vld [vmem:[%s2978_s0 + $0xd4] ss:$8 sps:$4 sm:$0xff]   ;;  %v1871_v7 = vld [vmem:[%s2978_s0 + $0xd0] ss:$8 sps:$4 sm:$0xff]  }
  0x18   :  { %v1869_v6 = vld [vmem:[%s2978_s0 + $0x2d4] ss:$8 sps:$4 sm:$0xff]   ;;  %v1872_v8 = vld [vmem:[%s2978_s0 + $0x2d0] ss:$8 sps:$4 sm:$0xff]  }
  0x1a   :  { %931 = vmatpush1.bf16.msra.mxu0 %v1779_v9  ;;  %1762 = vmatpush1.bf16.msra.mxu1 %v1779_v9  ;;  %v1873_v9 = vld [vmem:[%s2978_s0 + $0xe4] ss:$8 sps:$4 sm:$0xff]  }
  0x1b   :  { %932 = vmatprep.subr.bf16.mxu0 %v1982_v0  ;;  %1747 = vmatprep.subr.bf16.mxu1 %v1982_v0 }
  0x1e   :  { %933 = vmatpush1.bf16.msra.mxu0 %v1780_v10  ;;  %1763 = vmatpush1.bf16.msra.mxu1 %v1780_v10  ;;  %v1875_v10 = vld [vmem:[%s2978_s0 + $0x2e4] ss:$8 sps:$4 sm:$0xff]  }
  0x1f   :  { %934 = vmatprep.subr.bf16.mxu0 %v1982_v0  ;;  %1748 = vmatprep.subr.bf16.mxu1 %v1982_v0 }
  0x22   :  { %935 = vmatpush1.bf16.msra.mxu0 %v1781_v11  ;;  %1764 = vmatpush1.bf16.msra.mxu1 %v1781_v11  ;;  %v1877_v11 = vld [vmem:[%s2978_s0 + $0xe0] ss:$8 sps:$4 sm:$0xff]  }
  0x23   :  { %936 = vmatprep.subr.bf16.mxu0 %v1982_v0  ;;  %1749 = vmatprep.subr.bf16.mxu1 %v1982_v0 }
  0x26   :  { %937 = vmatpush1.bf16.msra.mxu0 %v1782_v12  ;;  %1765 = vmatpush1.bf16.msra.mxu1 %v1782_v12  ;;  %v1878_v12 = vld [vmem:[%s2978_s0 + $0x2e0] ss:$8 sps:$4 sm:$0xff]  }
  0x27   :  { %938 = vmatprep.subr.bf16.mxu0 %v1982_v0  ;;  %1750 = vmatprep.subr.bf16.mxu1 %v1982_v0 }
  0x2a   :  { %939 = vmatpush1.bf16.msra.mxu0 %v1783_v13  ;;  %1766 = vmatpush1.bf16.msra.mxu1 %v1783_v13  ;;  %v1879_v13 = vld [vmem:[%s2978_s0 + $0xf4] ss:$8 sps:$4 sm:$0xff]  }
  0x2b   :  { %940 = vmatprep.subr.bf16.mxu0 %v1982_v0  ;;  %1751 = vmatprep.subr.bf16.mxu1 %v1982_v0 }
  0x2e   :  { %941 = vmatpush1.bf16.msra.mxu0 %v1784_v14  ;;  %1767 = vmatpush1.bf16.msra.mxu1 %v1784_v14  ;;  %v1881_v14 = vld [vmem:[%s2978_s0 + $0x2f4] ss:$8 sps:$4 sm:$0xff]  }
  0x2f   :  { %942 = vmatprep.subr.bf16.mxu0 %v1982_v0  ;;  %1752 = vmatprep.subr.bf16.mxu1 %v1982_v0 }
  0x32   :  { %943 = vmatpush1.bf16.msra.mxu0 %v1785_v15  ;;  %1768 = vmatpush1.bf16.msra.mxu1 %v1785_v15  ;;  %v1883_v15 = vld [vmem:[%s2978_s0 + $0xf0] ss:$8 sps:$4 sm:$0xff]  }
  0x33   :  { %944 = vmatprep.subr.bf16.mxu0 %v1982_v0  ;;  %1753 = vmatprep.subr.bf16.mxu1 %v1982_v0 }
  0x36   :  { %945 = vmatpush1.bf16.msra.mxu0 %v1786_v16  ;;  %1769 = vmatpush1.bf16.msra.mxu1 %v1786_v16  ;;  %v1884_v16 = vld [vmem:[%s2978_s0 + $0x2f0] ss:$8 sps:$4 sm:$0xff]  }
  0x37   :  { %946 = vmatprep.subr.bf16.mxu0 %v1982_v0  ;;  %1754 = vmatprep.subr.bf16.mxu1 %v1982_v0 }
  0x3a   :  { %947 = vmatpush1.bf16.msra.mxu0 %v1787_v17  ;;  %1770 = vmatpush1.bf16.msra.mxu1 %v1787_v17  ;;  %v1885_v17 = vld [vmem:[%s2978_s0 + $0x104] ss:$8 sps:$4 sm:$0xff]  }
  0x3b   :  { %948 = vmatprep.subr.bf16.mxu0 %v1982_v0  ;;  %1755 = vmatprep.subr.bf16.mxu1 %v1982_v0  ;;  %v1860_v0 = vld [vmem:[%s2978_s0 + $0x2b0] ss:$8 sps:$4 sm:$0xff]  }
  0x3e   :  { %949 = vmatpush1.bf16.msra.mxu0 %v1788_v18  ;;  %1771 = vmatpush1.bf16.msra.mxu1 %v1788_v18  ;;  %v1887_v18 = vld [vmem:[%s2978_s0 + $0x304] ss:$8 sps:$4 sm:$0xff]  }
  0x41   :  { %951 = vmatmul.mubr.bf16.vlgmr.msra.gmra.mrb[0].mxu0 %v1789_v19  ;;  %1207 = vmatmul.mubr.bf16.vlgmr.msra.gmra.mrb[0].mxu1 %v1792_v20  ;;  %v1889_v19 = vld [vmem:[%s2978_s0 + $0x100] ss:$8 sps:$4 sm:$0xff]  }
  0x42   :  { %958 = vmatprep.mubr.bf16.mxu0 %v1795_v21  ;;  %1214 = vmatprep.mubr.bf16.mxu1 %v1797_v22  ;;  %v1890_v20 = vld [vmem:[%s2978_s0 + $0x300] ss:$8 sps:$4 sm:$0xff]   ;;  %v1891_v21 = vld [vmem:[%s2978_s0 + $0x114] ss:$8 sps:$4 sm:$0xff]  }
  0x43   :  { %v1893_v22 = vld [vmem:[%s2978_s0 + $0x314] ss:$8 sps:$4 sm:$0xff]  }
  0x49   :  { %959 = vmatmul.mubr.bf16.gmra.mrb[4].mxu0 %v1799_v23  ;;  %1215 = vmatmul.mubr.bf16.gmra.mrb[4].mxu1 %v1800_v24  ;;  %v1895_v23 = vld [vmem:[%s2978_s0 + $0x110] ss:$8 sps:$4 sm:$0xff]  }
  0x4a   :  { %966 = vmatprep.mubr.bf16.mxu0 %v1801_v25  ;;  %1222 = vmatprep.mubr.bf16.mxu1 %v1803_v26  ;;  %v1896_v24 = vld [vmem:[%s2978_s0 + $0x310] ss:$8 sps:$4 sm:$0xff]   ;;  %v1897_v25 = vld [vmem:[%s2978_s0 + $0x124] ss:$8 sps:$4 sm:$0xff]  }
  0x4b   :  { %v1899_v26 = vld [vmem:[%s2978_s0 + $0x324] ss:$8 sps:$4 sm:$0xff]  }
  0x51   :  { %967 = vmatmul.mubr.bf16.gmra.mrb[8].mxu0 %v1805_v27  ;;  %1223 = vmatmul.mubr.bf16.gmra.mrb[8].mxu1 %v1806_v28  ;;  %v1901_v27 = vld [vmem:[%s2978_s0 + $0x120] ss:$8 sps:$4 sm:$0xff]  }
  0x52   :  { %974 = vmatprep.mubr.bf16.mxu0 %v1807_v29  ;;  %1230 = vmatprep.mubr.bf16.mxu1 %v1809_v30  ;;  %v1902_v28 = vld [vmem:[%s2978_s0 + $0x320] ss:$8 sps:$4 sm:$0xff]   ;;  %v1903_v29 = vld [vmem:[%s2978_s0 + $0x134] ss:$8 sps:$4 sm:$0xff]  }
  0x53   :  { %v1905_v30 = vld [vmem:[%s2978_s0 + $0x334] ss:$8 sps:$4 sm:$0xff]  }
  0x59   :  { %975 = vmatmul.mubr.bf16.gmra.mrb[12].mxu0 %v1811_v31  ;;  %1231 = vmatmul.mubr.bf16.gmra.mrb[12].mxu1 %v1812_v32  ;;  %v1907_v31 = vld [vmem:[%s2978_s0 + $0x130] ss:$8 sps:$4 sm:$0xff]  }
  0x5a   :  { %982 = vmatprep.mubr.bf16.mxu0 %v1813_v33  ;;  %1238 = vmatprep.mubr.bf16.mxu1 %v1815_v34  ;;  %v1908_v32 = vld [vmem:[%s2978_s0 + $0x330] ss:$8 sps:$4 sm:$0xff]   ;;  %v1909_v33 = vld [vmem:[%s2978_s0 + $0x144] ss:$8 sps:$4 sm:$0xff]  }
  0x5b   :  { %v1911_v34 = vld [vmem:[%s2978_s0 + $0x344] ss:$8 sps:$4 sm:$0xff]  }
  0x61   :  { %983 = vmatmul.mubr.bf16.gmra.mrb[16].mxu0 %v1817_v35  ;;  %1239 = vmatmul.mubr.bf16.gmra.mrb[16].mxu1 %v1818_v36  ;;  %v1913_v35 = vld [vmem:[%s2978_s0 + $0x140] ss:$8 sps:$4 sm:$0xff]  }
  0x62   :  { %990 = vmatprep.mubr.bf16.mxu0 %v1819_v37  ;;  %1246 = vmatprep.mubr.bf16.mxu1 %v1821_v38  ;;  %v1914_v36 = vld [vmem:[%s2978_s0 + $0x340] ss:$8 sps:$4 sm:$0xff]   ;;  %v1915_v37 = vld [vmem:[%s2978_s0 + $0x154] ss:$8 sps:$4 sm:$0xff]  }
  0x63   :  { %v1917_v38 = vld [vmem:[%s2978_s0 + $0x354] ss:$8 sps:$4 sm:$0xff]  }
  0x69   :  { %991 = vmatmul.mubr.bf16.gmra.mrb[20].mxu0 %v1823_v39  ;;  %1247 = vmatmul.mubr.bf16.gmra.mrb[20].mxu1 %v1824_v40  ;;  %v1919_v39 = vld [vmem:[%s2978_s0 + $0x150] ss:$8 sps:$4 sm:$0xff]  }
  0x6a   :  { %998 = vmatprep.mubr.bf16.mxu0 %v1825_v41  ;;  %1254 = vmatprep.mubr.bf16.mxu1 %v1827_v42  ;;  %v1920_v40 = vld [vmem:[%s2978_s0 + $0x350] ss:$8 sps:$4 sm:$0xff]   ;;  %v1921_v41 = vld [vmem:[%s2978_s0 + $0x164] ss:$8 sps:$4 sm:$0xff]  }
  0x6b   :  { %v1923_v42 = vld [vmem:[%s2978_s0 + $0x364] ss:$8 sps:$4 sm:$0xff]  }
  0x71   :  { %999 = vmatmul.mubr.bf16.gmra.mrb[24].mxu0 %v1829_v43  ;;  %1255 = vmatmul.mubr.bf16.gmra.mrb[24].mxu1 %v1830_v44  ;;  %v1925_v43 = vld [vmem:[%s2978_s0 + $0x160] ss:$8 sps:$4 sm:$0xff]  }
  0x72   :  { %1006 = vmatprep.mubr.bf16.mxu0 %v1831_v45  ;;  %1262 = vmatprep.mubr.bf16.mxu1 %v1833_v46  ;;  %v1926_v44 = vld [vmem:[%s2978_s0 + $0x360] ss:$8 sps:$4 sm:$0xff]   ;;  %v1927_v45 = vld [vmem:[%s2978_s0 + $0x174] ss:$8 sps:$4 sm:$0xff]  }
  0x73   :  { %v1929_v46 = vld [vmem:[%s2978_s0 + $0x374] ss:$8 sps:$4 sm:$0xff]  }
  0x79   :  { %1007 = vmatmul.mubr.bf16.gmra.mrb[28].mxu0 %v1835_v47  ;;  %1263 = vmatmul.mubr.bf16.gmra.mrb[28].mxu1 %v1836_v48  ;;  %v1931_v47 = vld [vmem:[%s2978_s0 + $0x170] ss:$8 sps:$4 sm:$0xff]  }
  0x7a   :  { %1014 = vmatprep.mubr.bf16.mxu0 %v1837_v49  ;;  %1270 = vmatprep.mubr.bf16.mxu1 %v1839_v50  ;;  %v1932_v48 = vld [vmem:[%s2978_s0 + $0x370] ss:$8 sps:$4 sm:$0xff]   ;;  %v1933_v49 = vld [vmem:[%s2978_s0 + $0x184] ss:$8 sps:$4 sm:$0xff]  }
  0x7b   :  { %v1935_v50 = vld [vmem:[%s2978_s0 + $0x384] ss:$8 sps:$4 sm:$0xff]  }
  0x81   :  { %1015 = vmatmul.mubr.bf16.gmra.mrb[32].mxu0 %v1841_v51  ;;  %1271 = vmatmul.mubr.bf16.gmra.mrb[32].mxu1 %v1842_v52  ;;  %v1937_v51 = vld [vmem:[%s2978_s0 + $0x180] ss:$8 sps:$4 sm:$0xff]  }
  0x82   :  { %1022 = vmatprep.mubr.bf16.mxu0 %v1843_v53  ;;  %1278 = vmatprep.mubr.bf16.mxu1 %v1845_v54  ;;  %v1938_v52 = vld [vmem:[%s2978_s0 + $0x380] ss:$8 sps:$4 sm:$0xff]   ;;  %v1939_v53 = vld [vmem:[%s2978_s0 + $0x194] ss:$8 sps:$4 sm:$0xff]  }
  0x83   :  { %v1941_v54 = vld [vmem:[%s2978_s0 + $0x394] ss:$8 sps:$4 sm:$0xff]  }
  0x89   :  { %1023 = vmatmul.mubr.bf16.gmra.mrb[36].mxu0 %v1847_v55  ;;  %1279 = vmatmul.mubr.bf16.gmra.mrb[36].mxu1 %v1848_v56  ;;  %v1943_v55 = vld [vmem:[%s2978_s0 + $0x190] ss:$8 sps:$4 sm:$0xff]  }
  0x8a   :  { %1030 = vmatprep.mubr.bf16.mxu0 %v1849_v57  ;;  %1286 = vmatprep.mubr.bf16.mxu1 %v1851_v58  ;;  %v1944_v56 = vld [vmem:[%s2978_s0 + $0x390] ss:$8 sps:$4 sm:$0xff]   ;;  %v1945_v57 = vld [vmem:[%s2978_s0 + $0x1a4] ss:$8 sps:$4 sm:$0xff]  }
  0x8b   :  { %v1947_v58 = vld [vmem:[%s2978_s0 + $0x3a4] ss:$8 sps:$4 sm:$0xff]  }
  0x91   :  { %1031 = vmatmul.mubr.bf16.gmra.mrb[40].mxu0 %v1853_v59  ;;  %1287 = vmatmul.mubr.bf16.gmra.mrb[40].mxu1 %v1854_v60  ;;  %v1949_v59 = vld [vmem:[%s2978_s0 + $0x1a0] ss:$8 sps:$4 sm:$0xff]  }
  0x92   :  { %1038 = vmatprep.mubr.bf16.mxu0 %v1855_v61  ;;  %1294 = vmatprep.mubr.bf16.mxu1 %v1857_v62  ;;  %v1950_v60 = vld [vmem:[%s2978_s0 + $0x3a0] ss:$8 sps:$4 sm:$0xff]   ;;  %v1951_v61 = vld [vmem:[%s2978_s0 + $0x1b4] ss:$8 sps:$4 sm:$0xff]  }
  0x93   :  { %v1953_v62 = vld [vmem:[%s2978_s0 + $0x3b4] ss:$8 sps:$4 sm:$0xff]  }
  0x99   :  { %1039 = vmatmul.mubr.bf16.gmra.mrb[44].mxu0 %v1859_v63  ;;  %1295 = vmatmul.mubr.bf16.gmra.mrb[44].mxu1 %v1860_v0  ;;  %v2416_v63 = vld [vmem:[%s2979_s2] ss:$0 sm:$0xff] }
  0x9a   :  { %1046 = vmatprep.mubr.bf16.mxu0 %v1861_v1  ;;  %1302 = vmatprep.mubr.bf16.mxu1 %v1863_v2 }
  0xa1   :  { %1047 = vmatmul.mubr.bf16.gmra.mrb[48].mxu0 %v1865_v3  ;;  %1303 = vmatmul.mubr.bf16.gmra.mrb[48].mxu1 %v1866_v4 }
  0xa2   :  { %1054 = vmatprep.mubr.bf16.mxu0 %v1867_v5  ;;  %1310 = vmatprep.mubr.bf16.mxu1 %v1869_v6  ;;  %v1955_v6 = vld [vmem:[%s2978_s0 + $0x1b0] ss:$8 sps:$4 sm:$0xff]  }
  0xa9   :  { %1055 = vmatmul.mubr.bf16.gmra.mrb[52].mxu0 %v1871_v7  ;;  %1311 = vmatmul.mubr.bf16.gmra.mrb[52].mxu1 %v1872_v8  ;;  %v1956_v7 = vld [vmem:[%s2978_s0 + $0x3b0] ss:$8 sps:$4 sm:$0xff]  }
  0xaa   :  { %1062 = vmatprep.mubr.bf16.mxu0 %v1873_v9  ;;  %1318 = vmatprep.mubr.bf16.mxu1 %v1875_v10  ;;  %v1957_v10 = vld [vmem:[%s2978_s0 + $0x1c4] ss:$8 sps:$4 sm:$0xff]  }
  0xb1   :  { %1063 = vmatmul.mubr.bf16.gmra.mrb[56].mxu0 %v1877_v11  ;;  %1319 = vmatmul.mubr.bf16.gmra.mrb[56].mxu1 %v1878_v12  ;;  %v1959_v11 = vld [vmem:[%s2978_s0 + $0x3c4] ss:$8 sps:$4 sm:$0xff]  }
  0xb2   :  { %1070 = vmatprep.mubr.bf16.mxu0 %v1879_v13  ;;  %1326 = vmatprep.mubr.bf16.mxu1 %v1881_v14 }
  0xb9   :  { %1071 = vmatmul.mubr.bf16.gmra.mrb[60].mxu0 %v1883_v15  ;;  %1327 = vmatmul.mubr.bf16.gmra.mrb[60].mxu1 %v1884_v16 }
  0xba   :  { %1078 = vmatprep.mubr.bf16.mxu0 %v1885_v17  ;;  %1334 = vmatprep.mubr.bf16.mxu1 %v1887_v18 }
  0xc1   :  { %1079 = vmatmul.mubr.bf16.gmra.mrb[64].mxu0 %v1889_v19  ;;  %1335 = vmatmul.mubr.bf16.gmra.mrb[64].mxu1 %v1890_v20 }
  0xc2   :  { %1086 = vmatprep.mubr.bf16.mxu0 %v1891_v21  ;;  %1342 = vmatprep.mubr.bf16.mxu1 %v1893_v22  ;;  %v1961_v22 = vld [vmem:[%s2978_s0 + $0x1c0] ss:$8 sps:$4 sm:$0xff]  }
  0xc9   :  { %1087 = vmatmul.mubr.bf16.gmra.mrb[68].mxu0 %v1895_v23  ;;  %1343 = vmatmul.mubr.bf16.gmra.mrb[68].mxu1 %v1896_v24  ;;  %v1962_v23 = vld [vmem:[%s2978_s0 + $0x3c0] ss:$8 sps:$4 sm:$0xff]  }
  0xca   :  { %1094 = vmatprep.mubr.bf16.mxu0 %v1897_v25  ;;  %1350 = vmatprep.mubr.bf16.mxu1 %v1899_v26  ;;  %v1963_v26 = vld [vmem:[%s2978_s0 + $0x1d4] ss:$8 sps:$4 sm:$0xff]  }
  0xd1   :  { %1095 = vmatmul.mubr.bf16.gmra.mrb[72].mxu0 %v1901_v27  ;;  %1351 = vmatmul.mubr.bf16.gmra.mrb[72].mxu1 %v1902_v28  ;;  %v1965_v27 = vld [vmem:[%s2978_s0 + $0x3d4] ss:$8 sps:$4 sm:$0xff]  }
  0xd2   :  { %1102 = vmatprep.mubr.bf16.mxu0 %v1903_v29  ;;  %1358 = vmatprep.mubr.bf16.mxu1 %v1905_v30 }
  0xd9   :  { %1103 = vmatmul.mubr.bf16.gmra.mrb[76].mxu0 %v1907_v31  ;;  %1359 = vmatmul.mubr.bf16.gmra.mrb[76].mxu1 %v1908_v32 }
  0xda   :  { %1110 = vmatprep.mubr.bf16.mxu0 %v1909_v33  ;;  %1366 = vmatprep.mubr.bf16.mxu1 %v1911_v34 }
  0xe1   :  { %1111 = vmatmul.mubr.bf16.gmra.mrb[80].mxu0 %v1913_v35  ;;  %1367 = vmatmul.mubr.bf16.gmra.mrb[80].mxu1 %v1914_v36 }
  0xe2   :  { %1118 = vmatprep.mubr.bf16.mxu0 %v1915_v37  ;;  %1374 = vmatprep.mubr.bf16.mxu1 %v1917_v38  ;;  %v1967_v38 = vld [vmem:[%s2978_s0 + $0x1d0] ss:$8 sps:$4 sm:$0xff]  }
  0xe9   :  { %1119 = vmatmul.mubr.bf16.gmra.mrb[84].mxu0 %v1919_v39  ;;  %1375 = vmatmul.mubr.bf16.gmra.mrb[84].mxu1 %v1920_v40  ;;  %v1968_v39 = vld [vmem:[%s2978_s0 + $0x3d0] ss:$8 sps:$4 sm:$0xff]  }
  0xea   :  { %1126 = vmatprep.mubr.bf16.mxu0 %v1921_v41  ;;  %1382 = vmatprep.mubr.bf16.mxu1 %v1923_v42  ;;  %v1969_v42 = vld [vmem:[%s2978_s0 + $0x1e4] ss:$8 sps:$4 sm:$0xff]  }
  0xf1   :  { %1127 = vmatmul.mubr.bf16.gmra.mrb[88].mxu0 %v1925_v43  ;;  %1383 = vmatmul.mubr.bf16.gmra.mrb[88].mxu1 %v1926_v44  ;;  %v1971_v43 = vld [vmem:[%s2978_s0 + $0x3e4] ss:$8 sps:$4 sm:$0xff]  }
  0xf2   :  { %1134 = vmatprep.mubr.bf16.mxu0 %v1927_v45  ;;  %1390 = vmatprep.mubr.bf16.mxu1 %v1929_v46 }
  0xf9   :  { %1135 = vmatmul.mubr.bf16.gmra.mrb[92].mxu0 %v1931_v47  ;;  %1391 = vmatmul.mubr.bf16.gmra.mrb[92].mxu1 %v1932_v48 }
  0xfa   :  { %1142 = vmatprep.mubr.bf16.mxu0 %v1933_v49  ;;  %1398 = vmatprep.mubr.bf16.mxu1 %v1935_v50 }
 0x101   :  { %1143 = vmatmul.mubr.bf16.gmra.mrb[96].mxu0 %v1937_v51  ;;  %1399 = vmatmul.mubr.bf16.gmra.mrb[96].mxu1 %v1938_v52 }
 0x102   :  { %1150 = vmatprep.mubr.bf16.mxu0 %v1939_v53  ;;  %1406 = vmatprep.mubr.bf16.mxu1 %v1941_v54  ;;  %v1973_v54 = vld [vmem:[%s2978_s0 + $0x1e0] ss:$8 sps:$4 sm:$0xff]  }
 0x109   :  { %1151 = vmatmul.mubr.bf16.gmra.mrb[100].mxu0 %v1943_v55  ;;  %1407 = vmatmul.mubr.bf16.gmra.mrb[100].mxu1 %v1944_v56  ;;  %v1974_v55 = vld [vmem:[%s2978_s0 + $0x3e0] ss:$8 sps:$4 sm:$0xff]  }
 0x10a   :  { %1158 = vmatprep.mubr.bf16.mxu0 %v1945_v57  ;;  %1414 = vmatprep.mubr.bf16.mxu1 %v1947_v58  ;;  %v1975_v58 = vld [vmem:[%s2978_s0 + $0x1f4] ss:$8 sps:$4 sm:$0xff]  }
 0x111   :  { %1159 = vmatmul.mubr.bf16.gmra.mrb[104].mxu0 %v1949_v59  ;;  %1415 = vmatmul.mubr.bf16.gmra.mrb[104].mxu1 %v1950_v60  ;;  %v1977_v59 = vld [vmem:[%s2978_s0 + $0x3f4] ss:$8 sps:$4 sm:$0xff]  }
 0x112   :  { %1166 = vmatprep.mubr.bf16.mxu0 %v1951_v61  ;;  %1422 = vmatprep.mubr.bf16.mxu1 %v1953_v62 }
 0x114   :  { %v952_v0 = vpop.f32.mrb[0].mxu0  ;;  %v1208_v1 = vpop.f32.mrb[0].mxu1 }
 0x115   :  { %v953_v2 = vadd.f32 %v2416_v63, %v952_v0  ;;  %v1209_v3 = vadd.f32 %v2416_v63, %v1208_v1  ;;  %v954_v4 = vpop.f32.mrb[1].mxu0  ;;  %v1210_v5 = vpop.f32.mrb[1].mxu1 }
 0x116   :  { %v955_v8 = vpop.f32.mrb[2].mxu0  ;;  %v1211_v9 = vpop.f32.mrb[2].mxu1 }
 0x117   :  { %1463 = vst [vmem:[%s2980_s3] sm:$0xff] %v953_v2  ;;  %1527 = vst [vmem:[%s2980_s3 + $0x200] sm:$0xff] %v1209_v3  ;;  %v956_v12 = vadd.f32 %v2416_v63, %v955_v8  ;;  %v1212_v13 = vadd.f32 %v2416_v63, %v1211_v9  ;;  %v957_v14 = vpop.f32.mrb[3].mxu0  ;;  %v1213_v15 = vpop.f32.mrb[3].mxu1  ;;  %v1980_v8 = vld [vmem:[%s2978_s0 + $0x3f0] ss:$8 sps:$4 sm:$0xff]  }
 0x119   :  { %1464 = vst [vmem:[%s2980_s3 + $0x8] sm:$0xff] %v956_v12  ;;  %1528 = vst [vmem:[%s2980_s3 + $0x208] sm:$0xff] %v1212_v13  ;;  %1167 = vmatmul.mubr.bf16.gmra.mrb[108].mxu0 %v1955_v6  ;;  %1423 = vmatmul.mubr.bf16.gmra.mrb[108].mxu1 %v1956_v7  ;;  %v1979_v7 = vld [vmem:[%s2978_s0 + $0x1f0] ss:$8 sps:$4 sm:$0xff]  }
 0x11a   :  { %1174 = vmatprep.mubr.bf16.mxu0 %v1957_v10  ;;  %1430 = vmatprep.mubr.bf16.mxu1 %v1959_v11 }
 0x11c   :  { %v960_v16 = vpop.f32.mrb[4].mxu0  ;;  %v1216_v17 = vpop.f32.mrb[4].mxu1 }
 0x11d   :  { %v961_v18 = vadd.f32 %v2416_v63, %v960_v16  ;;  %v1217_v19 = vadd.f32 %v2416_v63, %v1216_v17  ;;  %v962_v20 = vpop.f32.mrb[5].mxu0  ;;  %v1218_v21 = vpop.f32.mrb[5].mxu1 }
 0x11e   :  { %v963_v24 = vpop.f32.mrb[6].mxu0  ;;  %v1219_v25 = vpop.f32.mrb[6].mxu1 }
 0x11f   :  { %1465 = vst [vmem:[%s2980_s3 + $0x10] sm:$0xff] %v961_v18  ;;  %1529 = vst [vmem:[%s2980_s3 + $0x210] sm:$0xff] %v1217_v19  ;;  %v964_v28 = vadd.f32 %v2416_v63, %v963_v24  ;;  %v1220_v29 = vadd.f32 %v2416_v63, %v1219_v25  ;;  %v965_v30 = vpop.f32.mrb[7].mxu0  ;;  %v1221_v31 = vpop.f32.mrb[7].mxu1 }
 0x121   :  { %1466 = vst [vmem:[%s2980_s3 + $0x18] sm:$0xff] %v964_v28  ;;  %1530 = vst [vmem:[%s2980_s3 + $0x218] sm:$0xff] %v1220_v29  ;;  %1175 = vmatmul.mubr.bf16.gmra.mrb[112].mxu0 %v1961_v22  ;;  %1431 = vmatmul.mubr.bf16.gmra.mrb[112].mxu1 %v1962_v23 }
 0x122   :  { %1182 = vmatprep.mubr.bf16.mxu0 %v1963_v26  ;;  %1438 = vmatprep.mubr.bf16.mxu1 %v1965_v27 }
 0x124   :  { %v968_v32 = vpop.f32.mrb[8].mxu0  ;;  %v1224_v33 = vpop.f32.mrb[8].mxu1 }
 0x125   :  { %v969_v34 = vadd.f32 %v2416_v63, %v968_v32  ;;  %v1225_v35 = vadd.f32 %v2416_v63, %v1224_v33  ;;  %v970_v36 = vpop.f32.mrb[9].mxu0  ;;  %v1226_v37 = vpop.f32.mrb[9].mxu1 }
 0x126   :  { %v971_v40 = vpop.f32.mrb[10].mxu0  ;;  %v1227_v41 = vpop.f32.mrb[10].mxu1 }
 0x127   :  { %1467 = vst [vmem:[%s2980_s3 + $0x20] sm:$0xff] %v969_v34  ;;  %1531 = vst [vmem:[%s2980_s3 + $0x220] sm:$0xff] %v1225_v35  ;;  %v972_v44 = vadd.f32 %v2416_v63, %v971_v40  ;;  %v1228_v45 = vadd.f32 %v2416_v63, %v1227_v41  ;;  %v973_v46 = vpop.f32.mrb[11].mxu0  ;;  %v1229_v47 = vpop.f32.mrb[11].mxu1 }
 0x129   :  { %1468 = vst [vmem:[%s2980_s3 + $0x28] sm:$0xff] %v972_v44  ;;  %1532 = vst [vmem:[%s2980_s3 + $0x228] sm:$0xff] %v1228_v45  ;;  %1183 = vmatmul.mubr.bf16.gmra.mrb[116].mxu0 %v1967_v38  ;;  %1439 = vmatmul.mubr.bf16.gmra.mrb[116].mxu1 %v1968_v39 }
 0x12a   :  { %1190 = vmatprep.mubr.bf16.mxu0 %v1969_v42  ;;  %1446 = vmatprep.mubr.bf16.mxu1 %v1971_v43 }
 0x12c   :  { %v976_v48 = vpop.f32.mrb[12].mxu0  ;;  %v1232_v49 = vpop.f32.mrb[12].mxu1 }
 0x12d   :  { %v977_v50 = vadd.f32 %v2416_v63, %v976_v48  ;;  %v1233_v51 = vadd.f32 %v2416_v63, %v1232_v49  ;;  %v978_v52 = vpop.f32.mrb[13].mxu0  ;;  %v1234_v53 = vpop.f32.mrb[13].mxu1 }
 0x12e   :  { %v979_v56 = vpop.f32.mrb[14].mxu0  ;;  %v1235_v57 = vpop.f32.mrb[14].mxu1 }
 0x12f   :  { %1469 = vst [vmem:[%s2980_s3 + $0x30] sm:$0xff] %v977_v50  ;;  %1533 = vst [vmem:[%s2980_s3 + $0x230] sm:$0xff] %v1233_v51  ;;  %v980_v60 = vadd.f32 %v2416_v63, %v979_v56  ;;  %v1236_v61 = vadd.f32 %v2416_v63, %v1235_v57  ;;  %v981_v62 = vpop.f32.mrb[15].mxu0  ;;  %v1237_v0 = vpop.f32.mrb[15].mxu1 }
 0x131   :  { %1470 = vst [vmem:[%s2980_s3 + $0x38] sm:$0xff] %v980_v60  ;;  %1534 = vst [vmem:[%s2980_s3 + $0x238] sm:$0xff] %v1236_v61  ;;  %1191 = vmatmul.mubr.bf16.gmra.mrb[120].mxu0 %v1973_v54  ;;  %1447 = vmatmul.mubr.bf16.gmra.mrb[120].mxu1 %v1974_v55 }
 0x132   :  { %1198 = vmatprep.mubr.bf16.mxu0 %v1975_v58  ;;  %1454 = vmatprep.mubr.bf16.mxu1 %v1977_v59 }
 0x134   :  { %v984_v1 = vpop.f32.mrb[16].mxu0  ;;  %v1240_v2 = vpop.f32.mrb[16].mxu1 }
 0x135   :  { %v985_v3 = vadd.f32 %v2416_v63, %v984_v1  ;;  %v1241_v4 = vadd.f32 %v2416_v63, %v1240_v2  ;;  %v986_v5 = vpop.f32.mrb[17].mxu0  ;;  %v1242_v6 = vpop.f32.mrb[17].mxu1 }
 0x136   :  { %v987_v9 = vpop.f32.mrb[18].mxu0  ;;  %v1243_v10 = vpop.f32.mrb[18].mxu1 }
 0x137   :  { %1471 = vst [vmem:[%s2980_s3 + $0x40] sm:$0xff] %v985_v3  ;;  %1535 = vst [vmem:[%s2980_s3 + $0x240] sm:$0xff] %v1241_v4  ;;  %v988_v11 = vadd.f32 %v2416_v63, %v987_v9  ;;  %v1244_v12 = vadd.f32 %v2416_v63, %v1243_v10  ;;  %v989_v13 = vpop.f32.mrb[19].mxu0  ;;  %v1245_v14 = vpop.f32.mrb[19].mxu1 }
 0x139   :  { %1472 = vst [vmem:[%s2980_s3 + $0x48] sm:$0xff] %v988_v11  ;;  %1536 = vst [vmem:[%s2980_s3 + $0x248] sm:$0xff] %v1244_v12  ;;  %1199 = vmatmul.mubr.bf16.gmra.mrb[124].mxu0 %v1979_v7  ;;  %1455 = vmatmul.mubr.bf16.gmra.mrb[124].mxu1 %v1980_v8 }
 0x13c   :  { %v992_v15 = vpop.f32.mrb[20].mxu0  ;;  %v1248_v16 = vpop.f32.mrb[20].mxu1 }
 0x13d   :  { %v993_v17 = vadd.f32 %v2416_v63, %v992_v15  ;;  %v1249_v18 = vadd.f32 %v2416_v63, %v1248_v16  ;;  %v994_v19 = vpop.f32.mrb[21].mxu0  ;;  %v1250_v20 = vpop.f32.mrb[21].mxu1 }
 0x13e   :  { %v995_v21 = vpop.f32.mrb[22].mxu0  ;;  %v1251_v22 = vpop.f32.mrb[22].mxu1 }
 0x13f   :  { %1473 = vst [vmem:[%s2980_s3 + $0x50] sm:$0xff] %v993_v17  ;;  %1537 = vst [vmem:[%s2980_s3 + $0x250] sm:$0xff] %v1249_v18  ;;  %v996_v23 = vadd.f32 %v2416_v63, %v995_v21  ;;  %v1252_v24 = vadd.f32 %v2416_v63, %v1251_v22  ;;  %v997_v25 = vpop.f32.mrb[23].mxu0  ;;  %v1253_v26 = vpop.f32.mrb[23].mxu1 }
 0x141   :  { %1474 = vst [vmem:[%s2980_s3 + $0x58] sm:$0xff] %v996_v23  ;;  %1538 = vst [vmem:[%s2980_s3 + $0x258] sm:$0xff] %v1252_v24 }
 0x144   :  { %v1000_v27 = vpop.f32.mrb[24].mxu0  ;;  %v1256_v28 = vpop.f32.mrb[24].mxu1 }
 0x145   :  { %v1001_v29 = vadd.f32 %v2416_v63, %v1000_v27  ;;  %v1257_v30 = vadd.f32 %v2416_v63, %v1256_v28  ;;  %v1002_v31 = vpop.f32.mrb[25].mxu0  ;;  %v1258_v32 = vpop.f32.mrb[25].mxu1 }
 0x146   :  { %v1003_v33 = vpop.f32.mrb[26].mxu0  ;;  %v1259_v34 = vpop.f32.mrb[26].mxu1 }
 0x147   :  { %1475 = vst [vmem:[%s2980_s3 + $0x60] sm:$0xff] %v1001_v29  ;;  %1539 = vst [vmem:[%s2980_s3 + $0x260] sm:$0xff] %v1257_v30  ;;  %v1004_v35 = vadd.f32 %v2416_v63, %v1003_v33  ;;  %v1260_v36 = vadd.f32 %v2416_v63, %v1259_v34  ;;  %v1005_v37 = vpop.f32.mrb[27].mxu0  ;;  %v1261_v38 = vpop.f32.mrb[27].mxu1 }
 0x149   :  { %1476 = vst [vmem:[%s2980_s3 + $0x68] sm:$0xff] %v1004_v35  ;;  %1540 = vst [vmem:[%s2980_s3 + $0x268] sm:$0xff] %v1260_v36 }
 0x14c   :  { %v1008_v39 = vpop.f32.mrb[28].mxu0  ;;  %v1264_v40 = vpop.f32.mrb[28].mxu1 }
 0x14d   :  { %v1009_v41 = vadd.f32 %v2416_v63, %v1008_v39  ;;  %v1265_v42 = vadd.f32 %v2416_v63, %v1264_v40  ;;  %v1010_v43 = vpop.f32.mrb[29].mxu0  ;;  %v1266_v44 = vpop.f32.mrb[29].mxu1 }
 0x14e   :  { %v1011_v45 = vpop.f32.mrb[30].mxu0  ;;  %v1267_v46 = vpop.f32.mrb[30].mxu1 }
 0x14f   :  { %1477 = vst [vmem:[%s2980_s3 + $0x70] sm:$0xff] %v1009_v41  ;;  %1541 = vst [vmem:[%s2980_s3 + $0x270] sm:$0xff] %v1265_v42  ;;  %v1012_v47 = vadd.f32 %v2416_v63, %v1011_v45  ;;  %v1268_v48 = vadd.f32 %v2416_v63, %v1267_v46  ;;  %v1013_v49 = vpop.f32.mrb[31].mxu0  ;;  %v1269_v50 = vpop.f32.mrb[31].mxu1 }
 0x151   :  { %1478 = vst [vmem:[%s2980_s3 + $0x78] sm:$0xff] %v1012_v47  ;;  %1542 = vst [vmem:[%s2980_s3 + $0x278] sm:$0xff] %v1268_v48 }
 0x154   :  { %v1016_v51 = vpop.f32.mrb[32].mxu0  ;;  %v1272_v52 = vpop.f32.mrb[32].mxu1 }
 0x155   :  { %v1017_v53 = vadd.f32 %v2416_v63, %v1016_v51  ;;  %v1273_v54 = vadd.f32 %v2416_v63, %v1272_v52  ;;  %v1018_v55 = vpop.f32.mrb[33].mxu0  ;;  %v1274_v56 = vpop.f32.mrb[33].mxu1 }
 0x156   :  { %v1019_v57 = vpop.f32.mrb[34].mxu0  ;;  %v1275_v58 = vpop.f32.mrb[34].mxu1 }
 0x157   :  { %1479 = vst [vmem:[%s2980_s3 + $0x80] sm:$0xff] %v1017_v53  ;;  %1543 = vst [vmem:[%s2980_s3 + $0x280] sm:$0xff] %v1273_v54  ;;  %v1020_v59 = vadd.f32 %v2416_v63, %v1019_v57  ;;  %v1276_v60 = vadd.f32 %v2416_v63, %v1275_v58  ;;  %v1021_v61 = vpop.f32.mrb[35].mxu0  ;;  %v1277_v62 = vpop.f32.mrb[35].mxu1 }
 0x159   :  { %1480 = vst [vmem:[%s2980_s3 + $0x88] sm:$0xff] %v1020_v59  ;;  %1544 = vst [vmem:[%s2980_s3 + $0x288] sm:$0xff] %v1276_v60 }
 0x15c   :  { %v1024_v0 = vpop.f32.mrb[36].mxu0  ;;  %v1280_v1 = vpop.f32.mrb[36].mxu1 }
 0x15d   :  { %v1025_v2 = vadd.f32 %v2416_v63, %v1024_v0  ;;  %v1281_v3 = vadd.f32 %v2416_v63, %v1280_v1  ;;  %v1026_v4 = vpop.f32.mrb[37].mxu0  ;;  %v1282_v5 = vpop.f32.mrb[37].mxu1 }
 0x15e   :  { %v1027_v6 = vpop.f32.mrb[38].mxu0  ;;  %v1283_v7 = vpop.f32.mrb[38].mxu1 }
 0x15f   :  { %1481 = vst [vmem:[%s2980_s3 + $0x90] sm:$0xff] %v1025_v2  ;;  %1545 = vst [vmem:[%s2980_s3 + $0x290] sm:$0xff] %v1281_v3  ;;  %v1028_v8 = vadd.f32 %v2416_v63, %v1027_v6  ;;  %v1284_v9 = vadd.f32 %v2416_v63, %v1283_v7  ;;  %v1029_v10 = vpop.f32.mrb[39].mxu0  ;;  %v1285_v11 = vpop.f32.mrb[39].mxu1 }
 0x161   :  { %1482 = vst [vmem:[%s2980_s3 + $0x98] sm:$0xff] %v1028_v8  ;;  %1546 = vst [vmem:[%s2980_s3 + $0x298] sm:$0xff] %v1284_v9 }
 0x164   :  { %v1032_v12 = vpop.f32.mrb[40].mxu0  ;;  %v1288_v13 = vpop.f32.mrb[40].mxu1 }
 0x165   :  { %v1033_v14 = vadd.f32 %v2416_v63, %v1032_v12  ;;  %v1289_v15 = vadd.f32 %v2416_v63, %v1288_v13  ;;  %v1034_v16 = vpop.f32.mrb[41].mxu0  ;;  %v1290_v17 = vpop.f32.mrb[41].mxu1 }
 0x166   :  { %v1035_v18 = vpop.f32.mrb[42].mxu0  ;;  %v1291_v19 = vpop.f32.mrb[42].mxu1 }
 0x167   :  { %1483 = vst [vmem:[%s2980_s3 + $0xa0] sm:$0xff] %v1033_v14  ;;  %1547 = vst [vmem:[%s2980_s3 + $0x2a0] sm:$0xff] %v1289_v15  ;;  %v1036_v20 = vadd.f32 %v2416_v63, %v1035_v18  ;;  %v1292_v21 = vadd.f32 %v2416_v63, %v1291_v19  ;;  %v1037_v22 = vpop.f32.mrb[43].mxu0  ;;  %v1293_v23 = vpop.f32.mrb[43].mxu1 }
 0x169   :  { %1484 = vst [vmem:[%s2980_s3 + $0xa8] sm:$0xff] %v1036_v20  ;;  %1548 = vst [vmem:[%s2980_s3 + $0x2a8] sm:$0xff] %v1292_v21 }
 0x16c   :  { %v1040_v24 = vpop.f32.mrb[44].mxu0  ;;  %v1296_v25 = vpop.f32.mrb[44].mxu1 }
 0x16d   :  { %v1041_v26 = vadd.f32 %v2416_v63, %v1040_v24  ;;  %v1297_v27 = vadd.f32 %v2416_v63, %v1296_v25  ;;  %v1042_v28 = vpop.f32.mrb[45].mxu0  ;;  %v1298_v29 = vpop.f32.mrb[45].mxu1 }
 0x16e   :  { %v1043_v30 = vpop.f32.mrb[46].mxu0  ;;  %v1299_v31 = vpop.f32.mrb[46].mxu1 }
 0x16f   :  { %1485 = vst [vmem:[%s2980_s3 + $0xb0] sm:$0xff] %v1041_v26  ;;  %1549 = vst [vmem:[%s2980_s3 + $0x2b0] sm:$0xff] %v1297_v27  ;;  %v1044_v32 = vadd.f32 %v2416_v63, %v1043_v30  ;;  %v1300_v33 = vadd.f32 %v2416_v63, %v1299_v31  ;;  %v1045_v34 = vpop.f32.mrb[47].mxu0  ;;  %v1301_v35 = vpop.f32.mrb[47].mxu1 }
 0x171   :  { %1486 = vst [vmem:[%s2980_s3 + $0xb8] sm:$0xff] %v1044_v32  ;;  %1550 = vst [vmem:[%s2980_s3 + $0x2b8] sm:$0xff] %v1300_v33 }
 0x174   :  { %v1048_v36 = vpop.f32.mrb[48].mxu0  ;;  %v1304_v37 = vpop.f32.mrb[48].mxu1 }
 0x175   :  { %v1049_v38 = vadd.f32 %v2416_v63, %v1048_v36  ;;  %v1305_v39 = vadd.f32 %v2416_v63, %v1304_v37  ;;  %v1050_v40 = vpop.f32.mrb[49].mxu0  ;;  %v1306_v41 = vpop.f32.mrb[49].mxu1 }
 0x176   :  { %v1051_v42 = vpop.f32.mrb[50].mxu0  ;;  %v1307_v43 = vpop.f32.mrb[50].mxu1 }
 0x177   :  { %1487 = vst [vmem:[%s2980_s3 + $0xc0] sm:$0xff] %v1049_v38  ;;  %1551 = vst [vmem:[%s2980_s3 + $0x2c0] sm:$0xff] %v1305_v39  ;;  %v1052_v44 = vadd.f32 %v2416_v63, %v1051_v42  ;;  %v1308_v45 = vadd.f32 %v2416_v63, %v1307_v43  ;;  %v1053_v46 = vpop.f32.mrb[51].mxu0  ;;  %v1309_v47 = vpop.f32.mrb[51].mxu1 }
 0x179   :  { %1488 = vst [vmem:[%s2980_s3 + $0xc8] sm:$0xff] %v1052_v44  ;;  %1552 = vst [vmem:[%s2980_s3 + $0x2c8] sm:$0xff] %v1308_v45 }
 0x17c   :  { %v1056_v48 = vpop.f32.mrb[52].mxu0  ;;  %v1312_v49 = vpop.f32.mrb[52].mxu1 }
 0x17d   :  { %v1057_v50 = vadd.f32 %v2416_v63, %v1056_v48  ;;  %v1313_v51 = vadd.f32 %v2416_v63, %v1312_v49  ;;  %v1058_v52 = vpop.f32.mrb[53].mxu0  ;;  %v1314_v53 = vpop.f32.mrb[53].mxu1 }
 0x17e   :  { %v1059_v54 = vpop.f32.mrb[54].mxu0  ;;  %v1315_v55 = vpop.f32.mrb[54].mxu1 }
 0x17f   :  { %1489 = vst [vmem:[%s2980_s3 + $0xd0] sm:$0xff] %v1057_v50  ;;  %1553 = vst [vmem:[%s2980_s3 + $0x2d0] sm:$0xff] %v1313_v51  ;;  %v1060_v56 = vadd.f32 %v2416_v63, %v1059_v54  ;;  %v1316_v57 = vadd.f32 %v2416_v63, %v1315_v55  ;;  %v1061_v58 = vpop.f32.mrb[55].mxu0  ;;  %v1317_v59 = vpop.f32.mrb[55].mxu1 }
 0x181   :  { %1490 = vst [vmem:[%s2980_s3 + $0xd8] sm:$0xff] %v1060_v56  ;;  %1554 = vst [vmem:[%s2980_s3 + $0x2d8] sm:$0xff] %v1316_v57 }
 0x184   :  { %v1064_v60 = vpop.f32.mrb[56].mxu0  ;;  %v1320_v61 = vpop.f32.mrb[56].mxu1 }
 0x185   :  { %v1065_v62 = vadd.f32 %v2416_v63, %v1064_v60  ;;  %v1321_v0 = vadd.f32 %v2416_v63, %v1320_v61  ;;  %v1066_v1 = vpop.f32.mrb[57].mxu0  ;;  %v1322_v2 = vpop.f32.mrb[57].mxu1 }
 0x186   :  { %v1067_v3 = vpop.f32.mrb[58].mxu0  ;;  %v1323_v4 = vpop.f32.mrb[58].mxu1 }
 0x187   :  { %1491 = vst [vmem:[%s2980_s3 + $0xe0] sm:$0xff] %v1065_v62  ;;  %1555 = vst [vmem:[%s2980_s3 + $0x2e0] sm:$0xff] %v1321_v0  ;;  %v1068_v5 = vadd.f32 %v2416_v63, %v1067_v3  ;;  %v1324_v6 = vadd.f32 %v2416_v63, %v1323_v4  ;;  %v1069_v7 = vpop.f32.mrb[59].mxu0  ;;  %v1325_v8 = vpop.f32.mrb[59].mxu1 }
 0x189   :  { %1492 = vst [vmem:[%s2980_s3 + $0xe8] sm:$0xff] %v1068_v5  ;;  %1556 = vst [vmem:[%s2980_s3 + $0x2e8] sm:$0xff] %v1324_v6 }
 0x18c   :  { %v1072_v9 = vpop.f32.mrb[60].mxu0  ;;  %v1328_v10 = vpop.f32.mrb[60].mxu1 }
 0x18d   :  { %v1073_v11 = vadd.f32 %v2416_v63, %v1072_v9  ;;  %v1329_v12 = vadd.f32 %v2416_v63, %v1328_v10  ;;  %v1074_v13 = vpop.f32.mrb[61].mxu0  ;;  %v1330_v14 = vpop.f32.mrb[61].mxu1 }
 0x18e   :  { %v1075_v15 = vpop.f32.mrb[62].mxu0  ;;  %v1331_v16 = vpop.f32.mrb[62].mxu1 }
 0x18f   :  { %1493 = vst [vmem:[%s2980_s3 + $0xf0] sm:$0xff] %v1073_v11  ;;  %1557 = vst [vmem:[%s2980_s3 + $0x2f0] sm:$0xff] %v1329_v12  ;;  %v1076_v17 = vadd.f32 %v2416_v63, %v1075_v15  ;;  %v1332_v18 = vadd.f32 %v2416_v63, %v1331_v16  ;;  %v1077_v19 = vpop.f32.mrb[63].mxu0  ;;  %v1333_v20 = vpop.f32.mrb[63].mxu1 }
 0x191   :  { %1494 = vst [vmem:[%s2980_s3 + $0xf8] sm:$0xff] %v1076_v17  ;;  %1558 = vst [vmem:[%s2980_s3 + $0x2f8] sm:$0xff] %v1332_v18 }
 0x194   :  { %v1080_v21 = vpop.f32.mrb[64].mxu0  ;;  %v1336_v22 = vpop.f32.mrb[64].mxu1 }
 0x195   :  { %v1081_v23 = vadd.f32 %v2416_v63, %v1080_v21  ;;  %v1337_v24 = vadd.f32 %v2416_v63, %v1336_v22  ;;  %v1082_v25 = vpop.f32.mrb[65].mxu0  ;;  %v1338_v26 = vpop.f32.mrb[65].mxu1 }
 0x196   :  { %v1083_v27 = vpop.f32.mrb[66].mxu0  ;;  %v1339_v28 = vpop.f32.mrb[66].mxu1 }
 0x197   :  { %1495 = vst [vmem:[%s2980_s3 + $0x100] sm:$0xff] %v1081_v23  ;;  %1559 = vst [vmem:[%s2980_s3 + $0x300] sm:$0xff] %v1337_v24  ;;  %v1084_v29 = vadd.f32 %v2416_v63, %v1083_v27  ;;  %v1340_v30 = vadd.f32 %v2416_v63, %v1339_v28  ;;  %v1085_v31 = vpop.f32.mrb[67].mxu0  ;;  %v1341_v32 = vpop.f32.mrb[67].mxu1 }
 0x199   :  { %1496 = vst [vmem:[%s2980_s3 + $0x108] sm:$0xff] %v1084_v29  ;;  %1560 = vst [vmem:[%s2980_s3 + $0x308] sm:$0xff] %v1340_v30 }
 0x19c   :  { %v1088_v33 = vpop.f32.mrb[68].mxu0  ;;  %v1344_v34 = vpop.f32.mrb[68].mxu1 }
 0x19d   :  { %v1089_v35 = vadd.f32 %v2416_v63, %v1088_v33  ;;  %v1345_v36 = vadd.f32 %v2416_v63, %v1344_v34  ;;  %v1090_v37 = vpop.f32.mrb[69].mxu0  ;;  %v1346_v38 = vpop.f32.mrb[69].mxu1 }
 0x19e   :  { %v1091_v39 = vpop.f32.mrb[70].mxu0  ;;  %v1347_v40 = vpop.f32.mrb[70].mxu1 }
 0x19f   :  { %1497 = vst [vmem:[%s2980_s3 + $0x110] sm:$0xff] %v1089_v35  ;;  %1561 = vst [vmem:[%s2980_s3 + $0x310] sm:$0xff] %v1345_v36  ;;  %v1092_v41 = vadd.f32 %v2416_v63, %v1091_v39  ;;  %v1348_v42 = vadd.f32 %v2416_v63, %v1347_v40  ;;  %v1093_v43 = vpop.f32.mrb[71].mxu0  ;;  %v1349_v44 = vpop.f32.mrb[71].mxu1 }
 0x1a1   :  { %1498 = vst [vmem:[%s2980_s3 + $0x118] sm:$0xff] %v1092_v41  ;;  %1562 = vst [vmem:[%s2980_s3 + $0x318] sm:$0xff] %v1348_v42 }
 0x1a4   :  { %v1096_v45 = vpop.f32.mrb[72].mxu0  ;;  %v1352_v46 = vpop.f32.mrb[72].mxu1 }
 0x1a5   :  { %v1097_v47 = vadd.f32 %v2416_v63, %v1096_v45  ;;  %v1353_v48 = vadd.f32 %v2416_v63, %v1352_v46  ;;  %v1098_v49 = vpop.f32.mrb[73].mxu0  ;;  %v1354_v50 = vpop.f32.mrb[73].mxu1 }
 0x1a6   :  { %v1099_v51 = vpop.f32.mrb[74].mxu0  ;;  %v1355_v52 = vpop.f32.mrb[74].mxu1 }
 0x1a7   :  { %1499 = vst [vmem:[%s2980_s3 + $0x120] sm:$0xff] %v1097_v47  ;;  %1563 = vst [vmem:[%s2980_s3 + $0x320] sm:$0xff] %v1353_v48  ;;  %v1100_v53 = vadd.f32 %v2416_v63, %v1099_v51  ;;  %v1356_v54 = vadd.f32 %v2416_v63, %v1355_v52  ;;  %v1101_v55 = vpop.f32.mrb[75].mxu0  ;;  %v1357_v56 = vpop.f32.mrb[75].mxu1 }
 0x1a9   :  { %1500 = vst [vmem:[%s2980_s3 + $0x128] sm:$0xff] %v1100_v53  ;;  %1564 = vst [vmem:[%s2980_s3 + $0x328] sm:$0xff] %v1356_v54 }
 0x1ac   :  { %v1104_v57 = vpop.f32.mrb[76].mxu0  ;;  %v1360_v58 = vpop.f32.mrb[76].mxu1 }
 0x1ad   :  { %v1105_v59 = vadd.f32 %v2416_v63, %v1104_v57  ;;  %v1361_v60 = vadd.f32 %v2416_v63, %v1360_v58  ;;  %v1106_v61 = vpop.f32.mrb[77].mxu0  ;;  %v1362_v62 = vpop.f32.mrb[77].mxu1 }
 0x1ae   :  { %v1107_v0 = vpop.f32.mrb[78].mxu0  ;;  %v1363_v1 = vpop.f32.mrb[78].mxu1 }
 0x1af   :  { %1501 = vst [vmem:[%s2980_s3 + $0x130] sm:$0xff] %v1105_v59  ;;  %1565 = vst [vmem:[%s2980_s3 + $0x330] sm:$0xff] %v1361_v60  ;;  %v1108_v2 = vadd.f32 %v2416_v63, %v1107_v0  ;;  %v1364_v3 = vadd.f32 %v2416_v63, %v1363_v1  ;;  %v1109_v4 = vpop.f32.mrb[79].mxu0  ;;  %v1365_v5 = vpop.f32.mrb[79].mxu1 }
 0x1b1   :  { %1502 = vst [vmem:[%s2980_s3 + $0x138] sm:$0xff] %v1108_v2  ;;  %1566 = vst [vmem:[%s2980_s3 + $0x338] sm:$0xff] %v1364_v3 }
 0x1b4   :  { %v1112_v6 = vpop.f32.mrb[80].mxu0  ;;  %v1368_v7 = vpop.f32.mrb[80].mxu1 }
 0x1b5   :  { %v1113_v8 = vadd.f32 %v2416_v63, %v1112_v6  ;;  %v1369_v9 = vadd.f32 %v2416_v63, %v1368_v7  ;;  %v1114_v10 = vpop.f32.mrb[81].mxu0  ;;  %v1370_v11 = vpop.f32.mrb[81].mxu1 }
 0x1b6   :  { %v1115_v12 = vpop.f32.mrb[82].mxu0  ;;  %v1371_v13 = vpop.f32.mrb[82].mxu1 }
 0x1b7   :  { %1503 = vst [vmem:[%s2980_s3 + $0x140] sm:$0xff] %v1113_v8  ;;  %1567 = vst [vmem:[%s2980_s3 + $0x340] sm:$0xff] %v1369_v9  ;;  %v1116_v14 = vadd.f32 %v2416_v63, %v1115_v12  ;;  %v1372_v15 = vadd.f32 %v2416_v63, %v1371_v13  ;;  %v1117_v16 = vpop.f32.mrb[83].mxu0  ;;  %v1373_v17 = vpop.f32.mrb[83].mxu1 }
 0x1b9   :  { %1504 = vst [vmem:[%s2980_s3 + $0x148] sm:$0xff] %v1116_v14  ;;  %1568 = vst [vmem:[%s2980_s3 + $0x348] sm:$0xff] %v1372_v15 }
 0x1bc   :  { %v1120_v18 = vpop.f32.mrb[84].mxu0  ;;  %v1376_v19 = vpop.f32.mrb[84].mxu1 }
 0x1bd   :  { %v1121_v20 = vadd.f32 %v2416_v63, %v1120_v18  ;;  %v1377_v21 = vadd.f32 %v2416_v63, %v1376_v19  ;;  %v1122_v22 = vpop.f32.mrb[85].mxu0  ;;  %v1378_v23 = vpop.f32.mrb[85].mxu1 }
 0x1be   :  { %v1123_v24 = vpop.f32.mrb[86].mxu0  ;;  %v1379_v25 = vpop.f32.mrb[86].mxu1 }
 0x1bf   :  { %1505 = vst [vmem:[%s2980_s3 + $0x150] sm:$0xff] %v1121_v20  ;;  %1569 = vst [vmem:[%s2980_s3 + $0x350] sm:$0xff] %v1377_v21  ;;  %v1124_v26 = vadd.f32 %v2416_v63, %v1123_v24  ;;  %v1380_v27 = vadd.f32 %v2416_v63, %v1379_v25  ;;  %v1125_v28 = vpop.f32.mrb[87].mxu0  ;;  %v1381_v29 = vpop.f32.mrb[87].mxu1 }
 0x1c1   :  { %1506 = vst [vmem:[%s2980_s3 + $0x158] sm:$0xff] %v1124_v26  ;;  %1570 = vst [vmem:[%s2980_s3 + $0x358] sm:$0xff] %v1380_v27 }
 0x1c4   :  { %v1128_v30 = vpop.f32.mrb[88].mxu0  ;;  %v1384_v31 = vpop.f32.mrb[88].mxu1 }
 0x1c5   :  { %v1129_v32 = vadd.f32 %v2416_v63, %v1128_v30  ;;  %v1385_v33 = vadd.f32 %v2416_v63, %v1384_v31  ;;  %v1130_v34 = vpop.f32.mrb[89].mxu0  ;;  %v1386_v35 = vpop.f32.mrb[89].mxu1 }
 0x1c6   :  { %v1131_v36 = vpop.f32.mrb[90].mxu0  ;;  %v1387_v37 = vpop.f32.mrb[90].mxu1 }
 0x1c7   :  { %1507 = vst [vmem:[%s2980_s3 + $0x160] sm:$0xff] %v1129_v32  ;;  %1571 = vst [vmem:[%s2980_s3 + $0x360] sm:$0xff] %v1385_v33  ;;  %v1132_v38 = vadd.f32 %v2416_v63, %v1131_v36  ;;  %v1388_v39 = vadd.f32 %v2416_v63, %v1387_v37  ;;  %v1133_v40 = vpop.f32.mrb[91].mxu0  ;;  %v1389_v41 = vpop.f32.mrb[91].mxu1 }
 0x1c9   :  { %1508 = vst [vmem:[%s2980_s3 + $0x168] sm:$0xff] %v1132_v38  ;;  %1572 = vst [vmem:[%s2980_s3 + $0x368] sm:$0xff] %v1388_v39 }
 0x1cc   :  { %v1136_v42 = vpop.f32.mrb[92].mxu0  ;;  %v1392_v43 = vpop.f32.mrb[92].mxu1 }
 0x1cd   :  { %v1137_v44 = vadd.f32 %v2416_v63, %v1136_v42  ;;  %v1393_v45 = vadd.f32 %v2416_v63, %v1392_v43  ;;  %v1138_v46 = vpop.f32.mrb[93].mxu0  ;;  %v1394_v47 = vpop.f32.mrb[93].mxu1 }
 0x1ce   :  { %v1139_v48 = vpop.f32.mrb[94].mxu0  ;;  %v1395_v49 = vpop.f32.mrb[94].mxu1 }
 0x1cf   :  { %1509 = vst [vmem:[%s2980_s3 + $0x170] sm:$0xff] %v1137_v44  ;;  %1573 = vst [vmem:[%s2980_s3 + $0x370] sm:$0xff] %v1393_v45  ;;  %v1140_v50 = vadd.f32 %v2416_v63, %v1139_v48  ;;  %v1396_v51 = vadd.f32 %v2416_v63, %v1395_v49  ;;  %v1141_v52 = vpop.f32.mrb[95].mxu0  ;;  %v1397_v53 = vpop.f32.mrb[95].mxu1 }
 0x1d1   :  { %1510 = vst [vmem:[%s2980_s3 + $0x178] sm:$0xff] %v1140_v50  ;;  %1574 = vst [vmem:[%s2980_s3 + $0x378] sm:$0xff] %v1396_v51 }
 0x1d4   :  { %v1144_v54 = vpop.f32.mrb[96].mxu0  ;;  %v1400_v55 = vpop.f32.mrb[96].mxu1 }
 0x1d5   :  { %v1145_v56 = vadd.f32 %v2416_v63, %v1144_v54  ;;  %v1401_v57 = vadd.f32 %v2416_v63, %v1400_v55  ;;  %v1146_v58 = vpop.f32.mrb[97].mxu0  ;;  %v1402_v59 = vpop.f32.mrb[97].mxu1 }
 0x1d6   :  { %v1147_v60 = vpop.f32.mrb[98].mxu0  ;;  %v1403_v61 = vpop.f32.mrb[98].mxu1  ;;  %v1981_v59 = vld [vmem:[%s2979_s2] ss:$0 sm:$0xff] }
 0x1d7   :  { %1511 = vst [vmem:[%s2980_s3 + $0x180] sm:$0xff] %v1145_v56  ;;  %1575 = vst [vmem:[%s2980_s3 + $0x380] sm:$0xff] %v1401_v57  ;;  %v1148_v62 = vadd.f32 %v2416_v63, %v1147_v60  ;;  %v1404_v0 = vadd.f32 %v2416_v63, %v1403_v61  ;;  %v1149_v1 = vpop.f32.mrb[99].mxu0  ;;  %v1405_v2 = vpop.f32.mrb[99].mxu1 }
 0x1d9   :  { %1512 = vst [vmem:[%s2980_s3 + $0x188] sm:$0xff] %v1148_v62  ;;  %1576 = vst [vmem:[%s2980_s3 + $0x388] sm:$0xff] %v1404_v0 }
 0x1dc   :  { %v1152_v3 = vpop.f32.mrb[100].mxu0  ;;  %v1408_v4 = vpop.f32.mrb[100].mxu1 }
 0x1dd   :  { %v1153_v5 = vadd.f32 %v2416_v63, %v1152_v3  ;;  %v1409_v6 = vadd.f32 %v2416_v63, %v1408_v4  ;;  %v1154_v7 = vpop.f32.mrb[101].mxu0  ;;  %v1410_v8 = vpop.f32.mrb[101].mxu1 }
 0x1de   :  { %v1155_v9 = vpop.f32.mrb[102].mxu0  ;;  %v1411_v10 = vpop.f32.mrb[102].mxu1 }
 0x1df   :  { %1513 = vst [vmem:[%s2980_s3 + $0x190] sm:$0xff] %v1153_v5  ;;  %1577 = vst [vmem:[%s2980_s3 + $0x390] sm:$0xff] %v1409_v6  ;;  %v1156_v11 = vadd.f32 %v2416_v63, %v1155_v9  ;;  %v1412_v12 = vadd.f32 %v2416_v63, %v1411_v10  ;;  %v1157_v13 = vpop.f32.mrb[103].mxu0  ;;  %v1413_v14 = vpop.f32.mrb[103].mxu1 }
 0x1e1   :  { %1514 = vst [vmem:[%s2980_s3 + $0x198] sm:$0xff] %v1156_v11  ;;  %1578 = vst [vmem:[%s2980_s3 + $0x398] sm:$0xff] %v1412_v12 }
 0x1e4   :  { %v1160_v15 = vpop.f32.mrb[104].mxu0  ;;  %v1416_v16 = vpop.f32.mrb[104].mxu1 }
 0x1e5   :  { %v1161_v17 = vadd.f32 %v2416_v63, %v1160_v15  ;;  %v1417_v18 = vadd.f32 %v2416_v63, %v1416_v16  ;;  %v1162_v19 = vpop.f32.mrb[105].mxu0  ;;  %v1418_v20 = vpop.f32.mrb[105].mxu1 }
 0x1e6   :  { %v1163_v21 = vpop.f32.mrb[106].mxu0  ;;  %v1419_v22 = vpop.f32.mrb[106].mxu1 }
 0x1e7   :  { %1515 = vst [vmem:[%s2980_s3 + $0x1a0] sm:$0xff] %v1161_v17  ;;  %1579 = vst [vmem:[%s2980_s3 + $0x3a0] sm:$0xff] %v1417_v18  ;;  %v1164_v23 = vadd.f32 %v2416_v63, %v1163_v21  ;;  %v1420_v24 = vadd.f32 %v2416_v63, %v1419_v22  ;;  %v1165_v25 = vpop.f32.mrb[107].mxu0  ;;  %v1421_v26 = vpop.f32.mrb[107].mxu1 }
 0x1e9   :  { %1516 = vst [vmem:[%s2980_s3 + $0x1a8] sm:$0xff] %v1164_v23  ;;  %1580 = vst [vmem:[%s2980_s3 + $0x3a8] sm:$0xff] %v1420_v24 }
 0x1ec   :  { %v1168_v27 = vpop.f32.mrb[108].mxu0  ;;  %v1424_v28 = vpop.f32.mrb[108].mxu1 }
 0x1ed   :  { %v1169_v29 = vadd.f32 %v2416_v63, %v1168_v27  ;;  %v1425_v30 = vadd.f32 %v2416_v63, %v1424_v28  ;;  %v1170_v31 = vpop.f32.mrb[109].mxu0  ;;  %v1426_v32 = vpop.f32.mrb[109].mxu1 }
 0x1ee   :  { %v1171_v33 = vpop.f32.mrb[110].mxu0  ;;  %v1427_v34 = vpop.f32.mrb[110].mxu1 }
 0x1ef   :  { %1517 = vst [vmem:[%s2980_s3 + $0x1b0] sm:$0xff] %v1169_v29  ;;  %1581 = vst [vmem:[%s2980_s3 + $0x3b0] sm:$0xff] %v1425_v30  ;;  %v1172_v35 = vadd.f32 %v2416_v63, %v1171_v33  ;;  %v1428_v36 = vadd.f32 %v2416_v63, %v1427_v34  ;;  %v1173_v37 = vpop.f32.mrb[111].mxu0  ;;  %v1429_v38 = vpop.f32.mrb[111].mxu1 }
 0x1f1   :  { %1518 = vst [vmem:[%s2980_s3 + $0x1b8] sm:$0xff] %v1172_v35  ;;  %1582 = vst [vmem:[%s2980_s3 + $0x3b8] sm:$0xff] %v1428_v36 }
 0x1f4   :  { %v1176_v39 = vpop.f32.mrb[112].mxu0  ;;  %v1432_v40 = vpop.f32.mrb[112].mxu1 }
 0x1f5   :  { %v1177_v41 = vadd.f32 %v2416_v63, %v1176_v39  ;;  %v1433_v42 = vadd.f32 %v2416_v63, %v1432_v40  ;;  %v1178_v43 = vpop.f32.mrb[113].mxu0  ;;  %v1434_v44 = vpop.f32.mrb[113].mxu1 }
 0x1f6   :  { %v1179_v45 = vpop.f32.mrb[114].mxu0  ;;  %v1435_v46 = vpop.f32.mrb[114].mxu1 }
 0x1f7   :  { %1519 = vst [vmem:[%s2980_s3 + $0x1c0] sm:$0xff] %v1177_v41  ;;  %1583 = vst [vmem:[%s2980_s3 + $0x3c0] sm:$0xff] %v1433_v42  ;;  %v1180_v47 = vadd.f32 %v2416_v63, %v1179_v45  ;;  %v1436_v48 = vadd.f32 %v2416_v63, %v1435_v46  ;;  %v1181_v49 = vpop.f32.mrb[115].mxu0  ;;  %v1437_v50 = vpop.f32.mrb[115].mxu1 }
 0x1f9   :  { %1520 = vst [vmem:[%s2980_s3 + $0x1c8] sm:$0xff] %v1180_v47  ;;  %1584 = vst [vmem:[%s2980_s3 + $0x3c8] sm:$0xff] %v1436_v48 }
 0x1fc   :  { %v1184_v51 = vpop.f32.mrb[116].mxu0  ;;  %v1440_v52 = vpop.f32.mrb[116].mxu1 }
 0x1fd   :  { %v1185_v53 = vadd.f32 %v2416_v63, %v1184_v51  ;;  %v1441_v54 = vadd.f32 %v2416_v63, %v1440_v52  ;;  %v1186_v55 = vpop.f32.mrb[117].mxu0  ;;  %v1442_v56 = vpop.f32.mrb[117].mxu1 }
 0x1fe   :  { %v1187_v57 = vpop.f32.mrb[118].mxu0  ;;  %v1443_v58 = vpop.f32.mrb[118].mxu1 }
 0x1ff   :  { %1521 = vst [vmem:[%s2980_s3 + $0x1d0] sm:$0xff] %v1185_v53  ;;  %1585 = vst [vmem:[%s2980_s3 + $0x3d0] sm:$0xff] %v1441_v54  ;;  %v1188_v60 = vadd.f32 %v1981_v59, %v1187_v57  ;;  %v1444_v61 = vadd.f32 %v1981_v59, %v1443_v58  ;;  %v1189_v62 = vpop.f32.mrb[119].mxu0  ;;  %v1445_v63 = vpop.f32.mrb[119].mxu1 }
 0x201   :  { %1522 = vst [vmem:[%s2980_s3 + $0x1d8] sm:$0xff] %v1188_v60  ;;  %1586 = vst [vmem:[%s2980_s3 + $0x3d8] sm:$0xff] %v1444_v61 }
 0x204   :  { %v1192_v0 = vpop.f32.mrb[120].mxu0  ;;  %v1448_v1 = vpop.f32.mrb[120].mxu1 }
 0x205   :  { %v1193_v2 = vadd.f32 %v1981_v59, %v1192_v0  ;;  %v1449_v3 = vadd.f32 %v1981_v59, %v1448_v1  ;;  %v1194_v4 = vpop.f32.mrb[121].mxu0  ;;  %v1450_v5 = vpop.f32.mrb[121].mxu1 }
 0x206   :  { %v1195_v6 = vpop.f32.mrb[122].mxu0  ;;  %v1451_v7 = vpop.f32.mrb[122].mxu1 }
 0x207   :  { %1523 = vst [vmem:[%s2980_s3 + $0x1e0] sm:$0xff] %v1193_v2  ;;  %1587 = vst [vmem:[%s2980_s3 + $0x3e0] sm:$0xff] %v1449_v3  ;;  %v1196_v8 = vadd.f32 %v1981_v59, %v1195_v6  ;;  %v1452_v9 = vadd.f32 %v1981_v59, %v1451_v7  ;;  %v1197_v10 = vpop.f32.mrb[123].mxu0  ;;  %v1453_v11 = vpop.f32.mrb[123].mxu1 }
 0x209   :  { %1524 = vst [vmem:[%s2980_s3 + $0x1e8] sm:$0xff] %v1196_v8  ;;  %1588 = vst [vmem:[%s2980_s3 + $0x3e8] sm:$0xff] %v1452_v9 }
 0x20c   :  { %v1200_v12 = vpop.f32.mrb[124].mxu0  ;;  %v1456_v13 = vpop.f32.mrb[124].mxu1 }
 0x20d   :  { %v1201_v14 = vadd.f32 %v1981_v59, %v1200_v12  ;;  %v1457_v15 = vadd.f32 %v1981_v59, %v1456_v13  ;;  %v1202_v16 = vpop.f32.mrb[125].mxu0  ;;  %v1458_v17 = vpop.f32.mrb[125].mxu1 }
 0x20e   :  { %v1203_v18 = vpop.f32.mrb[126].mxu0  ;;  %v1459_v19 = vpop.f32.mrb[126].mxu1 }
 0x20f   :  { %1525 = vst [vmem:[%s2980_s3 + $0x1f0] sm:$0xff] %v1201_v14  ;;  %1589 = vst [vmem:[%s2980_s3 + $0x3f0] sm:$0xff] %v1457_v15  ;;  %v1204_v20 = vadd.f32 %v1981_v59, %v1203_v18  ;;  %v1460_v21 = vadd.f32 %v1981_v59, %v1459_v19  ;;  %v1205_v22 = vpop.f32.mrb[127].mxu0  ;;  %v1461_v23 = vpop.f32.mrb[127].mxu1 }
 0x211   :  { %1526 = vst [vmem:[%s2980_s3 + $0x1f8] sm:$0xff] %v1204_v20  ;;  %1590 = vst [vmem:[%s2980_s3 + $0x3f8] sm:$0xff] %v1460_v21 }

</bundles_post_ra>
